<compile_context>
chip_gen: v5e
topology: v5e:2x2
jax: 0.10.0
libtpu: 0.0.40
codegen_flags: <defaults>
</compile_context>

<pallas_src>
import functools

import jax
import jax.numpy as jnp
import numpy as np
from jax.experimental import pallas as pl
from jax.experimental.pallas import tpu as pltpu


# ------------------------------ kernel body -------------------------------- #
def _conv3_im2col(x, pad_ref, w_flat, b_row, slope, matmul_dtype):
    """Conv1d(k=3, stride=1, pad=1) on (T, Cin) as one im2col MXU matmul.

    `pad_ref` is a zero-initialized (T+2, Cmax) VMEM scratch; rows 0 and T+1
    are never written, so they supply the zero padding for the shifted views.
    """
    T, C = x.shape
    pad_ref[pl.ds(1, T), pl.ds(0, C)] = x
    x_prev = pad_ref[pl.ds(0, T), pl.ds(0, C)]           # x[t-1], zero at t=0
    x_next = pad_ref[pl.ds(2, T), pl.ds(0, C)]           # x[t+1], zero at t=T-1
    xim = jnp.concatenate([x_prev, x, x_next], axis=-1)  # (T, 3*Cin)
    y = jnp.dot(xim.astype(matmul_dtype), w_flat.astype(matmul_dtype),
                preferred_element_type=jnp.float32)
    y = y + b_row                                        # f32 bias add
    if slope is not None:
        y = jnp.where(y >= 0.0, y, y * slope)            # LeakyReLU (f32)
    return y


def _make_stage_kernel(op_kinds, matmul_dtype):
    """Build a fused-stage kernel. op_kinds: tuple of ('conv', slope)/('res', None)."""

    def kernel(*refs):
        x_ref, o_ref, pad_ref = refs[0], refs[-2], refs[-1]
        wb = refs[1:-2]

        # Zero once per grid step; rows 0 and T+1 stay zero -> conv padding.
        pad_ref[...] = jnp.zeros_like(pad_ref)

        x = x_ref[0].astype(jnp.float32)                  # (T, Cin)
        i = 0
        for kind, slope in op_kinds:
            if kind == "conv":
                w, b = wb[i][...], wb[i + 1][...]
                i += 2
                x = _conv3_im2col(x, pad_ref, w, b, slope, matmul_dtype)
            else:  # fused ResBlock: conv -> LeakyReLU -> conv, + skip (f32)
                w1, b1, w2, b2 = (wb[i][...], wb[i + 1][...],
                                  wb[i + 2][...], wb[i + 3][...])
                i += 4
                h = _conv3_im2col(x, pad_ref, w1, b1, 0.2, matmul_dtype)
                x = _conv3_im2col(h, pad_ref, w2, b2, None, matmul_dtype) + x
        o_ref[0] = x.astype(o_ref.dtype)

    return kernel


def _run_stage(x, stage, matmul_dtype):
    """One pallas_call applying a fused run of convs/ResBlocks at fixed T."""
    B, T, Cin = x.shape
    convs = stage["convs"]
    c_out = convs[-1]["w"].shape[-1]
    c_max = max(Cin, max(c["w"].shape[0] // 3 for c in convs))

    args = [x]
    in_specs = [pl.BlockSpec((1, T, Cin), lambda b: (b, 0, 0))]
    for c in convs:
        w = c["w"].astype(matmul_dtype)                  # bf16 on v6e/v7x path
        b = c["b"]                                       # bias stays f32
        args += [w, b]
        in_specs += [pl.BlockSpec(w.shape, lambda i: (0, 0)),
                     pl.BlockSpec(b.shape, lambda i: (0, 0))]

    kernel = _make_stage_kernel(tuple(stage["ops"]), matmul_dtype)
    return pl.pallas_call(
        kernel,
        out_shape=jax.ShapeDtypeStruct((B, T, c_out), x.dtype),
        grid=(B,),
        in_specs=in_specs,
        out_specs=pl.BlockSpec((1, T, c_out), lambda b: (b, 0, 0)),
        scratch_shapes=[pltpu.VMEM((T + 2, c_max), jnp.float32)],
        compiler_params=pltpu.CompilerParams(
            dimension_semantics=("parallel",)),
    )(*args)


# --------------------------- plan construction ----------------------------- #
def _flatten_conv_w(w):
    # (3, Cin, Cout), tap-major -> (3*Cin, Cout); row k*Cin+ci hits x[t-1+k][ci].
    k, cin, cout = w.shape
    return w.reshape(k * cin, cout)


def _fuse_upsample_conv(w, b):
    """Fold nearest-x2 upsample into the following k=3 conv.

    Returns w_up: (3*Cin, 2*Cout), b_up: (1, 2*Cout) so that on im2col(x):
      cols [:Cout]  -> conv(upsample(x))[2t]
      cols [Cout:]  -> conv(upsample(x))[2t+1]
    """
    w0, w1, w2 = w[0], w[1], w[2]
    z = jnp.zeros_like(w0)
    even = jnp.concatenate([w0, w1 + w2, z], axis=0)      # (3*Cin, Cout)
    odd = jnp.concatenate([z, w0 + w1, w2], axis=0)       # (3*Cin, Cout)
    w_up = jnp.concatenate([even, odd], axis=1)           # (3*Cin, 2*Cout)
    b_up = jnp.concatenate([b, b]).reshape(1, -1)
    return w_up, b_up


def build_pallas_plan(layers):
    """Group the layer list into fused Pallas stages.

    A stage ends right after each fused upsample-conv (the wrapper then
    de-interleaves time with a free row-major reshape).
    """
    stages = []
    cur_ops, cur_convs = [], []

    def flush(upsample_out):
        nonlocal cur_ops, cur_convs
        if cur_ops:
            stages.append({"ops": cur_ops, "convs": cur_convs,
                           "upsample_out": upsample_out})
        cur_ops, cur_convs = [], []

    i = 0
    while i < len(layers):
        layer = layers[i]
        kind = layer["kind"]
        if kind == "conv":
            cur_ops.append(("conv", layer["slope"]))
            cur_convs.append({"w": _flatten_conv_w(layer["w"]),
                              "b": layer["b"].reshape(1, -1)})
            i += 1
        elif kind == "resblock":
            cur_ops.append(("res", None))
            cur_convs.append({"w": _flatten_conv_w(layer["w1"]),
                              "b": layer["b1"].reshape(1, -1)})
            cur_convs.append({"w": _flatten_conv_w(layer["w2"]),
                              "b": layer["b2"].reshape(1, -1)})
            i += 1
        elif kind == "upsample":
            conv = layers[i + 1]
            assert conv["kind"] == "conv"
            w_up, b_up = _fuse_upsample_conv(conv["w"], conv["b"])
            cur_ops.append(("conv", conv["slope"]))       # LeakyReLU(0.2) folded
            cur_convs.append({"w": w_up, "b": b_up})
            flush(upsample_out=True)
            i += 2
        else:
            raise ValueError(kind)
    flush(upsample_out=False)
    return stages


def vq_decoder_forward(x, plan, matmul_dtype=jnp.float32):
    """x: (B, T, input_size) -> (B, T * 2**n_up, channels[-1])."""
    for stage in plan:
        x = _run_stage(x, stage, matmul_dtype)
        if stage["upsample_out"]:
            B, T, C2 = x.shape
            x = x.reshape(B, 2 * T, C2 // 2)   # de-interleave even/odd phases
    return x


# --------------------------- parameter init -------------------------------- #
def _xavier_normal_conv(key, cin, cout, ksize=3):
    # nn.init.xavier_normal_ on a Conv1d weight (cout, cin, k):
    # std = sqrt(2 / (fan_in + fan_out)), fan_in = cin*k, fan_out = cout*k.
    std = float(np.sqrt(2.0 / (cin * ksize + cout * ksize)))
    # stored as (k, cin, cout) for channels-last matmuls
    return std * jax.random.normal(key, (ksize, cin, cout), dtype=jnp.float32)


def init_vq_decoder_params(key, input_size, channels, n_resblk, n_up):
    assert len(channels) == n_up + 1
    layers = []
    if input_size != channels[0]:
        key, sub = jax.random.split(key)
        layers.append(dict(kind="conv",
                           w=_xavier_normal_conv(sub, input_size, channels[0]),
                           b=jnp.zeros((channels[0],), jnp.float32),
                           slope=None))
    for _ in range(n_resblk):
        key, k1, k2 = jax.random.split(key, 3)
        layers.append(dict(kind="resblock",
                           w1=_xavier_normal_conv(k1, channels[0], channels[0]),
                           b1=jnp.zeros((channels[0],), jnp.float32),
                           w2=_xavier_normal_conv(k2, channels[0], channels[0]),
                           b2=jnp.zeros((channels[0],), jnp.float32)))
    for i in range(n_up):
        key, sub = jax.random.split(key)
        layers.append(dict(kind="upsample"))
        layers.append(dict(kind="conv",
                           w=_xavier_normal_conv(sub, channels[i], channels[i + 1]),
                           b=jnp.zeros((channels[i + 1],), jnp.float32),
                           slope=0.2))
    key, sub = jax.random.split(key)
    layers.append(dict(kind="conv",
                       w=_xavier_normal_conv(sub, channels[-1], channels[-1]),
                       b=jnp.zeros((channels[-1],), jnp.float32),
                       slope=None))
    return layers


# --------------------------- plain-JAX reference --------------------------- #
def _conv1d_ref(x, w, b, act_slope=None, residual=None):
    xp = jnp.pad(x, ((0, 0), (1, 1), (0, 0)))
    y = (jnp.einsum("btc,cd->btd", xp[:, :-2], w[0])
         + jnp.einsum("btc,cd->btd", xp[:, 1:-1], w[1])
         + jnp.einsum("btc,cd->btd", xp[:, 2:], w[2])
         + b.reshape(1, 1, -1))
    if act_slope is not None:
        y = jnp.where(y >= 0, y, act_slope * y)
    if residual is not None:
        y = y + residual
    return y


def vq_decoder_forward_ref(x, layers):
    for layer in layers:
        kind = layer["kind"]
        if kind == "conv":
            x = _conv1d_ref(x, layer["w"], layer["b"], act_slope=layer["slope"])
        elif kind == "resblock":
            r = x
            h = _conv1d_ref(x, layer["w1"], layer["b1"], act_slope=0.2)
            x = _conv1d_ref(h, layer["w2"], layer["b2"], residual=r)
        elif kind == "upsample":
            x = jnp.repeat(x, 2, axis=1)
    return x


# ---------------------------------- main ----------------------------------- #
if __name__ == "__main__":
    B, T = 2, 8
    input_size = 12
    channels = [32, 16, 8]
    n_resblk, n_up = 2, 2

    key = jax.random.PRNGKey(0)
    pkey, xkey = jax.random.split(key)
    layers = init_vq_decoder_params(pkey, input_size, channels, n_resblk, n_up)
    x = jax.random.normal(xkey, (B, T, input_size), dtype=jnp.float32)

    plan = build_pallas_plan(layers)
    ref = vq_decoder_forward_ref(x, layers)

    # f32 path: strict check against the plain-JAX reference.
    fwd_f32 = jax.jit(functools.partial(vq_decoder_forward, plan=plan,
                                        matmul_dtype=jnp.float32))
    out = jax.block_until_ready(fwd_f32(x))
    assert out.shape == (B, T * (2 ** n_up), channels[-1]), out.shape
    np.testing.assert_allclose(np.asarray(out), np.asarray(ref),
                               rtol=1e-3, atol=1e-3)

    # bf16 MXU operands (recommended on v6e/v7x); f32 accumulation + epilogue.
    fwd_bf16 = jax.jit(functools.partial(vq_decoder_forward, plan=plan,
                                         matmul_dtype=jnp.bfloat16))
    out_bf16 = jax.block_until_ready(fwd_bf16(x))
    np.testing.assert_allclose(np.asarray(out_bf16), np.asarray(ref),
                               rtol=5e-2, atol=5e-2)

    print("KERNEL_OK")
</pallas_src>

<mosaic_0001>
module attributes {stable_mosaic.version = 11 : i64} {
  func.func @kernel(%arg0: i32, %arg1: memref<1x8x12xf32, #tpu.memory_space<vmem>>, %arg2: memref<36x32xf32, #tpu.memory_space<vmem>>, %arg3: memref<1x32xf32, #tpu.memory_space<vmem>>, %arg4: memref<96x32xf32, #tpu.memory_space<vmem>>, %arg5: memref<1x32xf32, #tpu.memory_space<vmem>>, %arg6: memref<96x32xf32, #tpu.memory_space<vmem>>, %arg7: memref<1x32xf32, #tpu.memory_space<vmem>>, %arg8: memref<96x32xf32, #tpu.memory_space<vmem>>, %arg9: memref<1x32xf32, #tpu.memory_space<vmem>>, %arg10: memref<96x32xf32, #tpu.memory_space<vmem>>, %arg11: memref<1x32xf32, #tpu.memory_space<vmem>>, %arg12: memref<96x32xf32, #tpu.memory_space<vmem>>, %arg13: memref<1x32xf32, #tpu.memory_space<vmem>>, %arg14: memref<1x8x32xf32, #tpu.memory_space<vmem>>, %arg15: memref<10x32xf32, #tpu.memory_space<vmem>>) attributes {dimension_semantics = [#tpu.dimension_semantics<parallel>], iteration_bounds = array<i64: 2>, scalar_prefetch = 0 : i64, scratch_operands = 1 : i64, tpu.core_type = #tpu.core_type<tc>, window_params = [{transform_indices = @transform_0, window_bounds = array<i64: 1, 8, 12>}, {pipeline_mode = #tpu.pipeline_mode<synchronous>, transform_indices = @transform_1, window_bounds = array<i64: 36, 32>}, {pipeline_mode = #tpu.pipeline_mode<synchronous>, transform_indices = @transform_2, window_bounds = array<i64: 1, 32>}, {pipeline_mode = #tpu.pipeline_mode<synchronous>, transform_indices = @transform_3, window_bounds = array<i64: 96, 32>}, {pipeline_mode = #tpu.pipeline_mode<synchronous>, transform_indices = @transform_4, window_bounds = array<i64: 1, 32>}, {pipeline_mode = #tpu.pipeline_mode<synchronous>, transform_indices = @transform_5, window_bounds = array<i64: 96, 32>}, {pipeline_mode = #tpu.pipeline_mode<synchronous>, transform_indices = @transform_6, window_bounds = array<i64: 1, 32>}, {pipeline_mode = #tpu.pipeline_mode<synchronous>, transform_indices = @transform_7, window_bounds = array<i64: 96, 32>}, {pipeline_mode = #tpu.pipeline_mode<synchronous>, transform_indices = @transform_8, window_bounds = array<i64: 1, 32>}, {pipeline_mode = #tpu.pipeline_mode<synchronous>, transform_indices = @transform_9, window_bounds = array<i64: 96, 32>}, {pipeline_mode = #tpu.pipeline_mode<synchronous>, transform_indices = @transform_10, window_bounds = array<i64: 1, 32>}, {pipeline_mode = #tpu.pipeline_mode<synchronous>, transform_indices = @transform_11, window_bounds = array<i64: 96, 32>}, {pipeline_mode = #tpu.pipeline_mode<synchronous>, transform_indices = @transform_12, window_bounds = array<i64: 1, 32>}, {transform_indices = @transform_13, window_bounds = array<i64: 1, 8, 32>}]} {
    %cst = arith.constant 0.000000e+00 : f32
    %0 = vector.broadcast %cst : f32 to vector<10x32xf32>
    %c0 = arith.constant 0 : index
    %c0_0 = arith.constant 0 : index
    %1 = vector.load %arg15[%c0, %c0_0] : memref<10x32xf32, #tpu.memory_space<vmem>>, vector<10x32xf32>
    tpu.vector_store %arg15[%c0, %c0_0], %0 {strides = array<i32>} : memref<10x32xf32, #tpu.memory_space<vmem>>, vector<10x32xf32>,
    %c0_1 = arith.constant 0 : index
    %c0_2 = arith.constant 0 : index
    %c0_3 = arith.constant 0 : index
    %2 = vector.load %arg1[%c0_1, %c0_2, %c0_3] : memref<1x8x12xf32, #tpu.memory_space<vmem>>, vector<1x8x12xf32>
    %3 = vector.shape_cast %2 : vector<1x8x12xf32> to vector<8x12xf32>
    %c0_4 = arith.constant 0 : index
    %c0_5 = arith.constant 0 : index
    %4 = vector.load %arg2[%c0_4, %c0_5] : memref<36x32xf32, #tpu.memory_space<vmem>>, vector<36x32xf32>
    %c0_6 = arith.constant 0 : index
    %c0_7 = arith.constant 0 : index
    %5 = vector.load %arg3[%c0_6, %c0_7] : memref<1x32xf32, #tpu.memory_space<vmem>>, vector<1x32xf32>
    %c1 = arith.constant 1 : index
    %c0_8 = arith.constant 0 : index
    %6 = vector.load %arg15[%c1, %c0_8] : memref<10x32xf32, #tpu.memory_space<vmem>>, vector<8x12xf32>
    tpu.vector_store %arg15[%c1, %c0_8], %3 {strides = array<i32>} : memref<10x32xf32, #tpu.memory_space<vmem>>, vector<8x12xf32>,
    %c0_9 = arith.constant 0 : index
    %c0_10 = arith.constant 0 : index
    %7 = vector.load %arg15[%c0_9, %c0_10] : memref<10x32xf32, #tpu.memory_space<vmem>>, vector<8x12xf32>
    %c2 = arith.constant 2 : index
    %c0_11 = arith.constant 0 : index
    %8 = vector.load %arg15[%c2, %c0_11] : memref<10x32xf32, #tpu.memory_space<vmem>>, vector<8x12xf32>
    %9 = tpu.concatenate %7, %3, %8 in 1 : vector<8x12xf32>, vector<8x12xf32>, vector<8x12xf32> -> vector<8x36xf32>
    %cst_12 = arith.constant dense<0.000000e+00> : vector<8x32xf32>
    %10 = tpu.matmul %9, %4, %cst_12 {dimension_numbers = #tpu.dot_dimension_numbers<[1], [0], [0], [1], [0, 0, 1, 1], [], []>} : vector<8x36xf32>, vector<36x32xf32>, vector<8x32xf32> -> vector<8x32xf32>
    %11 = vector.broadcast %5 : vector<1x32xf32> to vector<8x32xf32>
    %12 = arith.addf %10, %11 : vector<8x32xf32>
    %c0_13 = arith.constant 0 : index
    %c0_14 = arith.constant 0 : index
    %13 = vector.load %arg4[%c0_13, %c0_14] : memref<96x32xf32, #tpu.memory_space<vmem>>, vector<96x32xf32>
    %c0_15 = arith.constant 0 : index
    %c0_16 = arith.constant 0 : index
    %14 = vector.load %arg5[%c0_15, %c0_16] : memref<1x32xf32, #tpu.memory_space<vmem>>, vector<1x32xf32>
    %c0_17 = arith.constant 0 : index
    %c0_18 = arith.constant 0 : index
    %15 = vector.load %arg6[%c0_17, %c0_18] : memref<96x32xf32, #tpu.memory_space<vmem>>, vector<96x32xf32>
    %c0_19 = arith.constant 0 : index
    %c0_20 = arith.constant 0 : index
    %16 = vector.load %arg7[%c0_19, %c0_20] : memref<1x32xf32, #tpu.memory_space<vmem>>, vector<1x32xf32>
    %c1_21 = arith.constant 1 : index
    %c0_22 = arith.constant 0 : index
    %17 = vector.load %arg15[%c1_21, %c0_22] : memref<10x32xf32, #tpu.memory_space<vmem>>, vector<8x32xf32>
    tpu.vector_store %arg15[%c1_21, %c0_22], %12 {strides = array<i32>} : memref<10x32xf32, #tpu.memory_space<vmem>>, vector<8x32xf32>,
    %c0_23 = arith.constant 0 : index
    %c0_24 = arith.constant 0 : index
    %18 = vector.load %arg15[%c0_23, %c0_24] : memref<10x32xf32, #tpu.memory_space<vmem>>, vector<8x32xf32>
    %c2_25 = arith.constant 2 : index
    %c0_26 = arith.constant 0 : index
    %19 = vector.load %arg15[%c2_25, %c0_26] : memref<10x32xf32, #tpu.memory_space<vmem>>, vector<8x32xf32>
    %20 = tpu.concatenate %18, %12, %19 in 1 : vector<8x32xf32>, vector<8x32xf32>, vector<8x32xf32> -> vector<8x96xf32>
    %cst_27 = arith.constant dense<0.000000e+00> : vector<8x32xf32>
    %21 = tpu.matmul %20, %13, %cst_27 {dimension_numbers = #tpu.dot_dimension_numbers<[1], [0], [0], [1], [0, 0, 1, 1], [], []>} : vector<8x96xf32>, vector<96x32xf32>, vector<8x32xf32> -> vector<8x32xf32>
    %22 = vector.broadcast %14 : vector<1x32xf32> to vector<8x32xf32>
    %23 = arith.addf %21, %22 : vector<8x32xf32>
    %cst_28 = arith.constant 0.000000e+00 : f32
    %24 = vector.broadcast %cst_28 : f32 to vector<8x32xf32>
    %25 = arith.cmpf oge, %23, %24 : vector<8x32xf32>
    %cst_29 = arith.constant 2.000000e-01 : f32
    %26 = vector.broadcast %cst_29 : f32 to vector<8x32xf32>
    %27 = arith.mulf %23, %26 : vector<8x32xf32>
    %28 = arith.select %25, %23, %27 : vector<8x32xi1>, vector<8x32xf32>
    %c1_30 = arith.constant 1 : index
    %c0_31 = arith.constant 0 : index
    %29 = vector.load %arg15[%c1_30, %c0_31] : memref<10x32xf32, #tpu.memory_space<vmem>>, vector<8x32xf32>
    tpu.vector_store %arg15[%c1_30, %c0_31], %28 {strides = array<i32>} : memref<10x32xf32, #tpu.memory_space<vmem>>, vector<8x32xf32>,
    %c0_32 = arith.constant 0 : index
    %c0_33 = arith.constant 0 : index
    %30 = vector.load %arg15[%c0_32, %c0_33] : memref<10x32xf32, #tpu.memory_space<vmem>>, vector<8x32xf32>
    %c2_34 = arith.constant 2 : index
    %c0_35 = arith.constant 0 : index
    %31 = vector.load %arg15[%c2_34, %c0_35] : memref<10x32xf32, #tpu.memory_space<vmem>>, vector<8x32xf32>
    %32 = tpu.concatenate %30, %28, %31 in 1 : vector<8x32xf32>, vector<8x32xf32>, vector<8x32xf32> -> vector<8x96xf32>
    %cst_36 = arith.constant dense<0.000000e+00> : vector<8x32xf32>
    %33 = tpu.matmul %32, %15, %cst_36 {dimension_numbers = #tpu.dot_dimension_numbers<[1], [0], [0], [1], [0, 0, 1, 1], [], []>} : vector<8x96xf32>, vector<96x32xf32>, vector<8x32xf32> -> vector<8x32xf32>
    %34 = vector.broadcast %16 : vector<1x32xf32> to vector<8x32xf32>
    %35 = arith.addf %33, %34 : vector<8x32xf32>
    %36 = arith.addf %35, %12 : vector<8x32xf32>
    %c0_37 = arith.constant 0 : index
    %c0_38 = arith.constant 0 : index
    %37 = vector.load %arg8[%c0_37, %c0_38] : memref<96x32xf32, #tpu.memory_space<vmem>>, vector<96x32xf32>
    %c0_39 = arith.constant 0 : index
    %c0_40 = arith.constant 0 : index
    %38 = vector.load %arg9[%c0_39, %c0_40] : memref<1x32xf32, #tpu.memory_space<vmem>>, vector<1x32xf32>
    %c0_41 = arith.constant 0 : index
    %c0_42 = arith.constant 0 : index
    %39 = vector.load %arg10[%c0_41, %c0_42] : memref<96x32xf32, #tpu.memory_space<vmem>>, vector<96x32xf32>
    %c0_43 = arith.constant 0 : index
    %c0_44 = arith.constant 0 : index
    %40 = vector.load %arg11[%c0_43, %c0_44] : memref<1x32xf32, #tpu.memory_space<vmem>>, vector<1x32xf32>
    %c1_45 = arith.constant 1 : index
    %c0_46 = arith.constant 0 : index
    %41 = vector.load %arg15[%c1_45, %c0_46] : memref<10x32xf32, #tpu.memory_space<vmem>>, vector<8x32xf32>
    tpu.vector_store %arg15[%c1_45, %c0_46], %36 {strides = array<i32>} : memref<10x32xf32, #tpu.memory_space<vmem>>, vector<8x32xf32>,
    %c0_47 = arith.constant 0 : index
    %c0_48 = arith.constant 0 : index
    %42 = vector.load %arg15[%c0_47, %c0_48] : memref<10x32xf32, #tpu.memory_space<vmem>>, vector<8x32xf32>
    %c2_49 = arith.constant 2 : index
    %c0_50 = arith.constant 0 : index
    %43 = vector.load %arg15[%c2_49, %c0_50] : memref<10x32xf32, #tpu.memory_space<vmem>>, vector<8x32xf32>
    %44 = tpu.concatenate %42, %36, %43 in 1 : vector<8x32xf32>, vector<8x32xf32>, vector<8x32xf32> -> vector<8x96xf32>
    %cst_51 = arith.constant dense<0.000000e+00> : vector<8x32xf32>
    %45 = tpu.matmul %44, %37, %cst_51 {dimension_numbers = #tpu.dot_dimension_numbers<[1], [0], [0], [1], [0, 0, 1, 1], [], []>} : vector<8x96xf32>, vector<96x32xf32>, vector<8x32xf32> -> vector<8x32xf32>
    %46 = vector.broadcast %38 : vector<1x32xf32> to vector<8x32xf32>
    %47 = arith.addf %45, %46 : vector<8x32xf32>
    %cst_52 = arith.constant 0.000000e+00 : f32
    %48 = vector.broadcast %cst_52 : f32 to vector<8x32xf32>
    %49 = arith.cmpf oge, %47, %48 : vector<8x32xf32>
    %cst_53 = arith.constant 2.000000e-01 : f32
    %50 = vector.broadcast %cst_53 : f32 to vector<8x32xf32>
    %51 = arith.mulf %47, %50 : vector<8x32xf32>
    %52 = arith.select %49, %47, %51 : vector<8x32xi1>, vector<8x32xf32>
    %c1_54 = arith.constant 1 : index
    %c0_55 = arith.constant 0 : index
    %53 = vector.load %arg15[%c1_54, %c0_55] : memref<10x32xf32, #tpu.memory_space<vmem>>, vector<8x32xf32>
    tpu.vector_store %arg15[%c1_54, %c0_55], %52 {strides = array<i32>} : memref<10x32xf32, #tpu.memory_space<vmem>>, vector<8x32xf32>,
    %c0_56 = arith.constant 0 : index
    %c0_57 = arith.constant 0 : index
    %54 = vector.load %arg15[%c0_56, %c0_57] : memref<10x32xf32, #tpu.memory_space<vmem>>, vector<8x32xf32>
    %c2_58 = arith.constant 2 : index
    %c0_59 = arith.constant 0 : index
    %55 = vector.load %arg15[%c2_58, %c0_59] : memref<10x32xf32, #tpu.memory_space<vmem>>, vector<8x32xf32>
    %56 = tpu.concatenate %54, %52, %55 in 1 : vector<8x32xf32>, vector<8x32xf32>, vector<8x32xf32> -> vector<8x96xf32>
    %cst_60 = arith.constant dense<0.000000e+00> : vector<8x32xf32>
    %57 = tpu.matmul %56, %39, %cst_60 {dimension_numbers = #tpu.dot_dimension_numbers<[1], [0], [0], [1], [0, 0, 1, 1], [], []>} : vector<8x96xf32>, vector<96x32xf32>, vector<8x32xf32> -> vector<8x32xf32>
    %58 = vector.broadcast %40 : vector<1x32xf32> to vector<8x32xf32>
    %59 = arith.addf %57, %58 : vector<8x32xf32>
    %60 = arith.addf %59, %36 : vector<8x32xf32>
    %c0_61 = arith.constant 0 : index
    %c0_62 = arith.constant 0 : index
    %61 = vector.load %arg12[%c0_61, %c0_62] : memref<96x32xf32, #tpu.memory_space<vmem>>, vector<96x32xf32>
    %c0_63 = arith.constant 0 : index
    %c0_64 = arith.constant 0 : index
    %62 = vector.load %arg13[%c0_63, %c0_64] : memref<1x32xf32, #tpu.memory_space<vmem>>, vector<1x32xf32>
    %c1_65 = arith.constant 1 : index
    %c0_66 = arith.constant 0 : index
    %63 = vector.load %arg15[%c1_65, %c0_66] : memref<10x32xf32, #tpu.memory_space<vmem>>, vector<8x32xf32>
    tpu.vector_store %arg15[%c1_65, %c0_66], %60 {strides = array<i32>} : memref<10x32xf32, #tpu.memory_space<vmem>>, vector<8x32xf32>,
    %c0_67 = arith.constant 0 : index
    %c0_68 = arith.constant 0 : index
    %64 = vector.load %arg15[%c0_67, %c0_68] : memref<10x32xf32, #tpu.memory_space<vmem>>, vector<8x32xf32>
    %c2_69 = arith.constant 2 : index
    %c0_70 = arith.constant 0 : index
    %65 = vector.load %arg15[%c2_69, %c0_70] : memref<10x32xf32, #tpu.memory_space<vmem>>, vector<8x32xf32>
    %66 = tpu.concatenate %64, %60, %65 in 1 : vector<8x32xf32>, vector<8x32xf32>, vector<8x32xf32> -> vector<8x96xf32>
    %cst_71 = arith.constant dense<0.000000e+00> : vector<8x32xf32>
    %67 = tpu.matmul %66, %61, %cst_71 {dimension_numbers = #tpu.dot_dimension_numbers<[1], [0], [0], [1], [0, 0, 1, 1], [], []>} : vector<8x96xf32>, vector<96x32xf32>, vector<8x32xf32> -> vector<8x32xf32>
    %68 = vector.broadcast %62 : vector<1x32xf32> to vector<8x32xf32>
    %69 = arith.addf %67, %68 : vector<8x32xf32>
    %cst_72 = arith.constant 0.000000e+00 : f32
    %70 = vector.broadcast %cst_72 : f32 to vector<8x32xf32>
    %71 = arith.cmpf oge, %69, %70 : vector<8x32xf32>
    %cst_73 = arith.constant 2.000000e-01 : f32
    %72 = vector.broadcast %cst_73 : f32 to vector<8x32xf32>
    %73 = arith.mulf %69, %72 : vector<8x32xf32>
    %74 = arith.select %71, %69, %73 : vector<8x32xi1>, vector<8x32xf32>
    %c0_74 = arith.constant 0 : index
    %c0_75 = arith.constant 0 : index
    %c0_76 = arith.constant 0 : index
    %75 = vector.load %arg14[%c0_74, %c0_75, %c0_76] : memref<1x8x32xf32, #tpu.memory_space<vmem>>, vector<1x8x32xf32>
    %76 = vector.shape_cast %75 : vector<1x8x32xf32> to vector<8x32xf32>
    %77 = vector.shape_cast %74 : vector<8x32xf32> to vector<1x8x32xf32>
    tpu.vector_store %arg14[%c0_74, %c0_75, %c0_76], %77 {strides = array<i32>} : memref<1x8x32xf32, #tpu.memory_space<vmem>>, vector<1x8x32xf32>,
    return
  }
  func.func @transform_0(%arg0: i32) -> (i32, i32, i32) {
    %c0_i32 = arith.constant 0 : i32
    %c0_i32_0 = arith.constant 0 : i32
    %c0_i32_1 = arith.constant 0 : i32
    return %arg0, %c0_i32, %c0_i32_0 : i32, i32, i32
  }
  func.func @transform_1(%arg0: i32) -> (i32, i32) {
    %c0_i32 = arith.constant 0 : i32
    %c0_i32_0 = arith.constant 0 : i32
    %c0_i32_1 = arith.constant 0 : i32
    return %c0_i32, %c0_i32_0 : i32, i32
  }
  func.func @transform_2(%arg0: i32) -> (i32, i32) {
    %c0_i32 = arith.constant 0 : i32
    %c0_i32_0 = arith.constant 0 : i32
    %c0_i32_1 = arith.constant 0 : i32
    return %c0_i32, %c0_i32_0 : i32, i32
  }
  func.func @transform_3(%arg0: i32) -> (i32, i32) {
    %c0_i32 = arith.constant 0 : i32
    %c0_i32_0 = arith.constant 0 : i32
    %c0_i32_1 = arith.constant 0 : i32
    return %c0_i32, %c0_i32_0 : i32, i32
  }
  func.func @transform_4(%arg0: i32) -> (i32, i32) {
    %c0_i32 = arith.constant 0 : i32
    %c0_i32_0 = arith.constant 0 : i32
    %c0_i32_1 = arith.constant 0 : i32
    return %c0_i32, %c0_i32_0 : i32, i32
  }
  func.func @transform_5(%arg0: i32) -> (i32, i32) {
    %c0_i32 = arith.constant 0 : i32
    %c0_i32_0 = arith.constant 0 : i32
    %c0_i32_1 = arith.constant 0 : i32
    return %c0_i32, %c0_i32_0 : i32, i32
  }
  func.func @transform_6(%arg0: i32) -> (i32, i32) {
    %c0_i32 = arith.constant 0 : i32
    %c0_i32_0 = arith.constant 0 : i32
    %c0_i32_1 = arith.constant 0 : i32
    return %c0_i32, %c0_i32_0 : i32, i32
  }
  func.func @transform_7(%arg0: i32) -> (i32, i32) {
    %c0_i32 = arith.constant 0 : i32
    %c0_i32_0 = arith.constant 0 : i32
    %c0_i32_1 = arith.constant 0 : i32
    return %c0_i32, %c0_i32_0 : i32, i32
  }
  func.func @transform_8(%arg0: i32) -> (i32, i32) {
    %c0_i32 = arith.constant 0 : i32
    %c0_i32_0 = arith.constant 0 : i32
    %c0_i32_1 = arith.constant 0 : i32
    return %c0_i32, %c0_i32_0 : i32, i32
  }
  func.func @transform_9(%arg0: i32) -> (i32, i32) {
    %c0_i32 = arith.constant 0 : i32
    %c0_i32_0 = arith.constant 0 : i32
    %c0_i32_1 = arith.constant 0 : i32
    return %c0_i32, %c0_i32_0 : i32, i32
  }
  func.func @transform_10(%arg0: i32) -> (i32, i32) {
    %c0_i32 = arith.constant 0 : i32
    %c0_i32_0 = arith.constant 0 : i32
    %c0_i32_1 = arith.constant 0 : i32
    return %c0_i32, %c0_i32_0 : i32, i32
  }
  func.func @transform_11(%arg0: i32) -> (i32, i32) {
    %c0_i32 = arith.constant 0 : i32
    %c0_i32_0 = arith.constant 0 : i32
    %c0_i32_1 = arith.constant 0 : i32
    return %c0_i32, %c0_i32_0 : i32, i32
  }
  func.func @transform_12(%arg0: i32) -> (i32, i32) {
    %c0_i32 = arith.constant 0 : i32
    %c0_i32_0 = arith.constant 0 : i32
    %c0_i32_1 = arith.constant 0 : i32
    return %c0_i32, %c0_i32_0 : i32, i32
  }
  func.func @transform_13(%arg0: i32) -> (i32, i32, i32) {
    %c0_i32 = arith.constant 0 : i32
    %c0_i32_0 = arith.constant 0 : i32
    %c0_i32_1 = arith.constant 0 : i32
    return %arg0, %c0_i32, %c0_i32_0 : i32, i32, i32
  }
}

module attributes {stable_mosaic.version = 11 : i64} {
  func.func @kernel(%arg0: i32, %arg1: memref<1x16x16xf32, #tpu.memory_space<vmem>>, %arg2: memref<48x16xf32, #tpu.memory_space<vmem>>, %arg3: memref<1x16xf32, #tpu.memory_space<vmem>>, %arg4: memref<1x16x16xf32, #tpu.memory_space<vmem>>, %arg5: memref<18x16xf32, #tpu.memory_space<vmem>>) attributes {dimension_semantics = [#tpu.dimension_semantics<parallel>], iteration_bounds = array<i64: 2>, scalar_prefetch = 0 : i64, scratch_operands = 1 : i64, tpu.core_type = #tpu.core_type<tc>, window_params = [{transform_indices = @transform_0, window_bounds = array<i64: 1, 16, 16>}, {pipeline_mode = #tpu.pipeline_mode<synchronous>, transform_indices = @transform_1, window_bounds = array<i64: 48, 16>}, {pipeline_mode = #tpu.pipeline_mode<synchronous>, transform_indices = @transform_2, window_bounds = array<i64: 1, 16>}, {transform_indices = @transform_3, window_bounds = array<i64: 1, 16, 16>}]} {
    %cst = arith.constant 0.000000e+00 : f32
    %0 = vector.broadcast %cst : f32 to vector<18x16xf32>
    %c0 = arith.constant 0 : index
    %c0_0 = arith.constant 0 : index
    %1 = vector.load %arg5[%c0, %c0_0] : memref<18x16xf32, #tpu.memory_space<vmem>>, vector<18x16xf32>
    tpu.vector_store %arg5[%c0, %c0_0], %0 {strides = array<i32>} : memref<18x16xf32, #tpu.memory_space<vmem>>, vector<18x16xf32>,
    %c0_1 = arith.constant 0 : index
    %c0_2 = arith.constant 0 : index
    %c0_3 = arith.constant 0 : index
    %2 = vector.load %arg1[%c0_1, %c0_2, %c0_3] : memref<1x16x16xf32, #tpu.memory_space<vmem>>, vector<1x16x16xf32>
    %3 = vector.shape_cast %2 : vector<1x16x16xf32> to vector<16x16xf32>
    %c0_4 = arith.constant 0 : index
    %c0_5 = arith.constant 0 : index
    %4 = vector.load %arg2[%c0_4, %c0_5] : memref<48x16xf32, #tpu.memory_space<vmem>>, vector<48x16xf32>
    %c0_6 = arith.constant 0 : index
    %c0_7 = arith.constant 0 : index
    %5 = vector.load %arg3[%c0_6, %c0_7] : memref<1x16xf32, #tpu.memory_space<vmem>>, vector<1x16xf32>
    %c1 = arith.constant 1 : index
    %c0_8 = arith.constant 0 : index
    %6 = vector.load %arg5[%c1, %c0_8] : memref<18x16xf32, #tpu.memory_space<vmem>>, vector<16x16xf32>
    tpu.vector_store %arg5[%c1, %c0_8], %3 {strides = array<i32>} : memref<18x16xf32, #tpu.memory_space<vmem>>, vector<16x16xf32>,
    %c0_9 = arith.constant 0 : index
    %c0_10 = arith.constant 0 : index
    %7 = vector.load %arg5[%c0_9, %c0_10] : memref<18x16xf32, #tpu.memory_space<vmem>>, vector<16x16xf32>
    %c2 = arith.constant 2 : index
    %c0_11 = arith.constant 0 : index
    %8 = vector.load %arg5[%c2, %c0_11] : memref<18x16xf32, #tpu.memory_space<vmem>>, vector<16x16xf32>
    %9 = tpu.concatenate %7, %3, %8 in 1 : vector<16x16xf32>, vector<16x16xf32>, vector<16x16xf32> -> vector<16x48xf32>
    %cst_12 = arith.constant dense<0.000000e+00> : vector<16x16xf32>
    %10 = tpu.matmul %9, %4, %cst_12 {dimension_numbers = #tpu.dot_dimension_numbers<[1], [0], [0], [1], [0, 0, 1, 1], [], []>} : vector<16x48xf32>, vector<48x16xf32>, vector<16x16xf32> -> vector<16x16xf32>
    %11 = vector.broadcast %5 : vector<1x16xf32> to vector<16x16xf32>
    %12 = arith.addf %10, %11 : vector<16x16xf32>
    %cst_13 = arith.constant 0.000000e+00 : f32
    %13 = vector.broadcast %cst_13 : f32 to vector<16x16xf32>
    %14 = arith.cmpf oge, %12, %13 : vector<16x16xf32>
    %cst_14 = arith.constant 2.000000e-01 : f32
    %15 = vector.broadcast %cst_14 : f32 to vector<16x16xf32>
    %16 = arith.mulf %12, %15 : vector<16x16xf32>
    %17 = arith.select %14, %12, %16 : vector<16x16xi1>, vector<16x16xf32>
    %c0_15 = arith.constant 0 : index
    %c0_16 = arith.constant 0 : index
    %c0_17 = arith.constant 0 : index
    %18 = vector.load %arg4[%c0_15, %c0_16, %c0_17] : memref<1x16x16xf32, #tpu.memory_space<vmem>>, vector<1x16x16xf32>
    %19 = vector.shape_cast %18 : vector<1x16x16xf32> to vector<16x16xf32>
    %20 = vector.shape_cast %17 : vector<16x16xf32> to vector<1x16x16xf32>
    tpu.vector_store %arg4[%c0_15, %c0_16, %c0_17], %20 {strides = array<i32>} : memref<1x16x16xf32, #tpu.memory_space<vmem>>, vector<1x16x16xf32>,
    return
  }
  func.func @transform_0(%arg0: i32) -> (i32, i32, i32) {
    %c0_i32 = arith.constant 0 : i32
    %c0_i32_0 = arith.constant 0 : i32
    %c0_i32_1 = arith.constant 0 : i32
    return %arg0, %c0_i32, %c0_i32_0 : i32, i32, i32
  }
  func.func @transform_1(%arg0: i32) -> (i32, i32) {
    %c0_i32 = arith.constant 0 : i32
    %c0_i32_0 = arith.constant 0 : i32
    %c0_i32_1 = arith.constant 0 : i32
    return %c0_i32, %c0_i32_0 : i32, i32
  }
  func.func @transform_2(%arg0: i32) -> (i32, i32) {
    %c0_i32 = arith.constant 0 : i32
    %c0_i32_0 = arith.constant 0 : i32
    %c0_i32_1 = arith.constant 0 : i32
    return %c0_i32, %c0_i32_0 : i32, i32
  }
  func.func @transform_3(%arg0: i32) -> (i32, i32, i32) {
    %c0_i32 = arith.constant 0 : i32
    %c0_i32_0 = arith.constant 0 : i32
    %c0_i32_1 = arith.constant 0 : i32
    return %arg0, %c0_i32, %c0_i32_0 : i32, i32, i32
  }
}

module attributes {stable_mosaic.version = 11 : i64} {
  func.func @kernel(%arg0: i32, %arg1: memref<1x32x8xf32, #tpu.memory_space<vmem>>, %arg2: memref<24x8xf32, #tpu.memory_space<vmem>>, %arg3: memref<1x8xf32, #tpu.memory_space<vmem>>, %arg4: memref<1x32x8xf32, #tpu.memory_space<vmem>>, %arg5: memref<34x8xf32, #tpu.memory_space<vmem>>) attributes {dimension_semantics = [#tpu.dimension_semantics<parallel>], iteration_bounds = array<i64: 2>, scalar_prefetch = 0 : i64, scratch_operands = 1 : i64, tpu.core_type = #tpu.core_type<tc>, window_params = [{transform_indices = @transform_0, window_bounds = array<i64: 1, 32, 8>}, {pipeline_mode = #tpu.pipeline_mode<synchronous>, transform_indices = @transform_1, window_bounds = array<i64: 24, 8>}, {pipeline_mode = #tpu.pipeline_mode<synchronous>, transform_indices = @transform_2, window_bounds = array<i64: 1, 8>}, {transform_indices = @transform_3, window_bounds = array<i64: 1, 32, 8>}]} {
    %cst = arith.constant 0.000000e+00 : f32
    %0 = vector.broadcast %cst : f32 to vector<34x8xf32>
    %c0 = arith.constant 0 : index
    %c0_0 = arith.constant 0 : index
    %1 = vector.load %arg5[%c0, %c0_0] : memref<34x8xf32, #tpu.memory_space<vmem>>, vector<34x8xf32>
    tpu.vector_store %arg5[%c0, %c0_0], %0 {strides = array<i32>} : memref<34x8xf32, #tpu.memory_space<vmem>>, vector<34x8xf32>,
    %c0_1 = arith.constant 0 : index
    %c0_2 = arith.constant 0 : index
    %c0_3 = arith.constant 0 : index
    %2 = vector.load %arg1[%c0_1, %c0_2, %c0_3] : memref<1x32x8xf32, #tpu.memory_space<vmem>>, vector<1x32x8xf32>
    %3 = vector.shape_cast %2 : vector<1x32x8xf32> to vector<32x8xf32>
    %c0_4 = arith.constant 0 : index
    %c0_5 = arith.constant 0 : index
    %4 = vector.load %arg2[%c0_4, %c0_5] : memref<24x8xf32, #tpu.memory_space<vmem>>, vector<24x8xf32>
    %c0_6 = arith.constant 0 : index
    %c0_7 = arith.constant 0 : index
    %5 = vector.load %arg3[%c0_6, %c0_7] : memref<1x8xf32, #tpu.memory_space<vmem>>, vector<1x8xf32>
    %c1 = arith.constant 1 : index
    %c0_8 = arith.constant 0 : index
    %6 = vector.load %arg5[%c1, %c0_8] : memref<34x8xf32, #tpu.memory_space<vmem>>, vector<32x8xf32>
    tpu.vector_store %arg5[%c1, %c0_8], %3 {strides = array<i32>} : memref<34x8xf32, #tpu.memory_space<vmem>>, vector<32x8xf32>,
    %c0_9 = arith.constant 0 : index
    %c0_10 = arith.constant 0 : index
    %7 = vector.load %arg5[%c0_9, %c0_10] : memref<34x8xf32, #tpu.memory_space<vmem>>, vector<32x8xf32>
    %c2 = arith.constant 2 : index
    %c0_11 = arith.constant 0 : index
    %8 = vector.load %arg5[%c2, %c0_11] : memref<34x8xf32, #tpu.memory_space<vmem>>, vector<32x8xf32>
    %9 = tpu.concatenate %7, %3, %8 in 1 : vector<32x8xf32>, vector<32x8xf32>, vector<32x8xf32> -> vector<32x24xf32>
    %cst_12 = arith.constant dense<0.000000e+00> : vector<32x8xf32>
    %10 = tpu.matmul %9, %4, %cst_12 {dimension_numbers = #tpu.dot_dimension_numbers<[1], [0], [0], [1], [0, 0, 1, 1], [], []>} : vector<32x24xf32>, vector<24x8xf32>, vector<32x8xf32> -> vector<32x8xf32>
    %11 = vector.broadcast %5 : vector<1x8xf32> to vector<32x8xf32>
    %12 = arith.addf %10, %11 : vector<32x8xf32>
    %c0_13 = arith.constant 0 : index
    %c0_14 = arith.constant 0 : index
    %c0_15 = arith.constant 0 : index
    %13 = vector.load %arg4[%c0_13, %c0_14, %c0_15] : memref<1x32x8xf32, #tpu.memory_space<vmem>>, vector<1x32x8xf32>
    %14 = vector.shape_cast %13 : vector<1x32x8xf32> to vector<32x8xf32>
    %15 = vector.shape_cast %12 : vector<32x8xf32> to vector<1x32x8xf32>
    tpu.vector_store %arg4[%c0_13, %c0_14, %c0_15], %15 {strides = array<i32>} : memref<1x32x8xf32, #tpu.memory_space<vmem>>, vector<1x32x8xf32>,
    return
  }
  func.func @transform_0(%arg0: i32) -> (i32, i32, i32) {
    %c0_i32 = arith.constant 0 : i32
    %c0_i32_0 = arith.constant 0 : i32
    %c0_i32_1 = arith.constant 0 : i32
    return %arg0, %c0_i32, %c0_i32_0 : i32, i32, i32
  }
  func.func @transform_1(%arg0: i32) -> (i32, i32) {
    %c0_i32 = arith.constant 0 : i32
    %c0_i32_0 = arith.constant 0 : i32
    %c0_i32_1 = arith.constant 0 : i32
    return %c0_i32, %c0_i32_0 : i32, i32
  }
  func.func @transform_2(%arg0: i32) -> (i32, i32) {
    %c0_i32 = arith.constant 0 : i32
    %c0_i32_0 = arith.constant 0 : i32
    %c0_i32_1 = arith.constant 0 : i32
    return %c0_i32, %c0_i32_0 : i32, i32
  }
  func.func @transform_3(%arg0: i32) -> (i32, i32, i32) {
    %c0_i32 = arith.constant 0 : i32
    %c0_i32_0 = arith.constant 0 : i32
    %c0_i32_1 = arith.constant 0 : i32
    return %arg0, %c0_i32, %c0_i32_0 : i32, i32, i32
  }
}

</mosaic_0001>

<bundles_post_ra>
// kernel: vq_decoder_forward.4
= control target key start
LH: loop header
LB: loop body
LE: loop exit
PB: predicated region body
PF: predicated region fallthrough
CT: control target
= control target key end

     0   :  { %s372_s12 = smov 0   ;;  %s425_s0 = inlined_call_operand.vmem [shape: f32[2,16,16], index: 0, kind: input, shape index: {}]   ;;  %s426_s1 = inlined_call_operand.vmem [shape: f32[48,16], index: 1, kind: input, shape index: {}]   ;;  %s427_s2 = inlined_call_operand.vmem [shape: f32[1,16], index: 2, kind: input, shape index: {}]   ;;  %s428_s3 = inlined_call_operand.vmem [shape: f32[2,16,16], index: 3, kind: output, shape index: {}]  }
   0x1 LB: > { %s308_s13 = sadd.s32 4294967295, %s347_s12   ;;  %p312_p0 = scmp.ge.s32.totalorder %s347_s12, 1  ;;  %s347_s12 = sphi %s372_s12, %s13_s12  }
   0x2   : > { %p137_p1 = scmp.lt.s32.totalorder %s347_s12, 3 }
   0x4   : > { %p138_p2 = pnand %p312_p0, %p137_p1 }
   0x5   : > { %p161_p3 = scmp.lt.s32.totalorder (!%p138_p2), %s308_s13, 1  ;;  %s350_s28 = smov (!%p138_p2), 16  }
   0x6   : > { %141 = sbr.rel (%p138_p2) target bundleno = 280 (0x118), region = 32  ;;  %s351_s29 = smov (!%p138_p2), 32  }
   0xb   : > { %vm171_vm0 = vcmask 130048   ;;  %vm174_vm1 = vcmask 123904   ;;  %v183_v0 = vld [vmem:[%s426_s1 + $0x28] sm:$0xff]  ;;  %v349_v1 = vmov 0.0   ;;  %v182_v2 = vld [vmem:[%s426_s1 + $0x20] sm:$0xff]  ;;  %s430_s13 = smov (!%p161_p3, %s308_s13), 1 }
   0xc   : > { %172 = vst.msk [vmem:[#allocation2] sm:$0xff] %vm171_vm0, %v349_v1  ;;  %232 = vmatpush.msra.mxu0 %v183_v0  ;;  %323 = vmatpush.msra.mxu1 %v183_v0  ;;  %v181_v3 = vld [vmem:[%s426_s1 + $0x18] sm:$0xff]  ;;  %s321_s20 = sshll.u32 %s430_s13, 4  ;;  %v180_v4 = vld [vmem:[%s426_s1 + $0x10] sm:$0xff]  ;;  %v179_v7 = vld [vmem:[%s426_s1 + $0x8] sm:$0xff]  ;;  %vm209_vm2 = vcmask 261120  }
   0xd   : > { %173 = vst.msk [vmem:[#allocation2 + $0x8] sm:$0xff] %vm171_vm0, %v349_v1  ;;  %s165_s25 = scalar_lea.vmem %s425_s0, %s321_s20  ;;  %v178_v10 = vld [vmem:[%s426_s1] sm:$0xff]  ;;  %vm215_vm3 = vcmask 392192   ;;  %s170_s9 = scalar_lea.vmem %s428_s3, %s321_s20 }
   0xe   : > { %175 = vst.msk [vmem:[#allocation2 + $0x10] sm:$0x3] %vm174_vm1, %v349_v1  ;;  %233 = vmatpush.msra.mxu0 %v182_v2  ;;  %324 = vmatpush.msra.mxu1 %v182_v2  ;;  %v176_v5 = vld [vmem:[%s165_s25] sm:$0xff]  ;;  %v177_v6 = vld [vmem:[%s165_s25 + $0x8] sm:$0xff] }
   0xf   : > { %186 = vst.msk [vmem:[#allocation2 + $0x9] sm:$0xff] %vm171_vm0, %v177_v6  ;;  %193 = vrot.lane.b32.xlu0 %v176_v5, %s350_s28  ;;  %v340_v21 = vld [vmem:[%s427_s2] ss:$0 sm:$0xff] }
  0x10   : > { %234 = vmatpush.msra.mxu0 %v181_v3  ;;  %325 = vmatpush.msra.mxu1 %v181_v3  ;;  %185 = vst.msk [vmem:[#allocation2 + $0x1] sm:$0xff] %vm171_vm0, %v176_v5 }
  0x12   : > { %235 = vmatpush.msra.mxu0 %v180_v4  ;;  %326 = vmatpush.msra.mxu1 %v180_v4 }
  0x14   : > { %236 = vmatpush.msra.mxu0 %v179_v7  ;;  %327 = vmatpush.msra.mxu1 %v179_v7 }
  0x16   : > { %v190_v9 = vld [vmem:[#allocation2 + $0xa] sm:$0xff]  ;;  %237 = vmatpush.msra.mxu0 %v178_v10  ;;  %328 = vmatpush.msra.mxu1 %v178_v10 }
  0x17   : > { %v189_v8 = vld [vmem:[#allocation2 + $0x2] sm:$0xff]  ;;  %195 = vrot.lane.b32.xlu0 %v177_v6, %s350_s28 }
  0x18   : > { %201 = vrot.lane.b32.xlu1 %v189_v8, %s351_s29  ;;  %v187_v12 = vld [vmem:[#allocation2] sm:$0xff]  ;;  %v188_v17 = vld [vmem:[#allocation2 + $0x8] sm:$0xff] }
  0x20   : > { %203 = vrot.lane.b32.xlu1 %v190_v9, %s351_s29 }
  0x81   : > { %v194_v11 = vpop.permute.xlu0 %193 }
  0x82   : > { %v207_v13 = vsel %vm171_vm0, %v187_v12, %v194_v11 }
  0x89   : > { %v196_v16 = vpop.permute.xlu0 %195 }
  0x8a   : > { %v202_v14 = vpop.permute.xlu1 %201  ;;  %v208_v18 = vsel %vm171_vm0, %v188_v17, %v196_v16 }
  0x8b   : > { %v210_v15 = vsel %vm209_vm2, %v207_v13, %v202_v14 }
  0x8c   : > { %317 = vmatmul.msk.f32.vlgmr.msra.gmra.mxu0 %vm215_vm3, %v210_v15 }
  0x92   : > { %v204_v19 = vpop.permute.xlu1 %203 }
  0x93   : > { %v211_v20 = vsel %vm209_vm2, %v208_v18, %v204_v19 }
  0x94   : > { %318 = vmatmul.msk.f32.vlgmr.msra.gmra.mxu1 %vm215_vm3, %v211_v20 }
 0x109   : > { %v239_v22 = vpop.f32.mrf.mxu0 }
 0x10a   : > { %v240_v23 = vadd.f32 %v340_v21, %v239_v22 }
 0x10c   : > { %vm245_vm4 = vcmp.ge.f32.partialorder %v240_v23, 0.0  ;;  %v247_v24 = vmul.f32 0.2, %v240_v23 }
 0x10e   : > { %v249_v25 = vsel %vm245_vm4, %v240_v23, %v247_v24 }
 0x10f   : > { %251 = vst.msk [vmem:[%s170_s9] sm:$0xff] %vm171_vm0, %v249_v25 }
 0x111   : > { %v242_v26 = vpop.f32.mrf.mxu1 }
 0x112   : > { %v243_v27 = vadd.f32 %v340_v21, %v242_v26 }
 0x114   : > { %vm246_vm5 = vcmp.ge.f32.partialorder %v243_v27, 0.0  ;;  %v248_v28 = vmul.f32 0.2, %v243_v27 }
 0x116   : > { %v250_v29 = vsel %vm246_vm5, %v243_v27, %v248_v28 }
 0x117   : > { %252 = vst.msk [vmem:[%s170_s9 + $0x8] sm:$0xff] %vm171_vm0, %v250_v29 }
 0x118 PF: > { %s13_s12 = sadd.s32 1, %s347_s12  }
 0x119   : > { %p10_p4 = scmp.ge.s32.totalorder %s13_s12, 4  }
 0x11b   :  { %12 = sbr.rel (!%p10_p4) target bundleno = 1 (0x1), region = 62 }

// kernel: vq_decoder_forward.5
= control target key start
LH: loop header
LB: loop body
LE: loop exit
PB: predicated region body
PF: predicated region fallthrough
CT: control target
= control target key end

     0   :  { %s412_s12 = smov 0   ;;  %s472_s0 = inlined_call_operand.vmem [shape: f32[2,32,8], index: 0, kind: input, shape index: {}]   ;;  %s473_s1 = inlined_call_operand.vmem [shape: f32[24,8], index: 1, kind: input, shape index: {}]   ;;  %s474_s2 = inlined_call_operand.vmem [shape: f32[1,8], index: 2, kind: input, shape index: {}]   ;;  %s475_s3 = inlined_call_operand.vmem [shape: f32[2,32,8], index: 3, kind: output, shape index: {}]  }
   0x1 LB: > { %s343_s13 = sadd.s32 4294967295, %s387_s12   ;;  %p347_p0 = scmp.ge.s32.totalorder %s387_s12, 1  ;;  %s387_s12 = sphi %s412_s12, %s13_s12  }
   0x2   : > { %p137_p1 = scmp.lt.s32.totalorder %s387_s12, 3 }
   0x4   : > { %p138_p2 = pnand %p347_p0, %p137_p1 }
   0x5   : > { %p161_p3 = scmp.lt.s32.totalorder (!%p138_p2), %s343_s13, 1  ;;  %s390_s18 = smov (!%p138_p2), 8  }
   0x6   : > { %141 = sbr.rel (%p138_p2) target bundleno = 289 (0x121), region = 32  ;;  %s391_s19 = smov (!%p138_p2), 16  }
   0xb   : > { %vm171_vm0 = vcmask 64512   ;;  %v389_v0 = vmov 0.0   ;;  %s477_s13 = smov (!%p161_p3, %s343_s13), 1  ;;  %vm176_vm1 = vcmask 58368   ;;  %v184_v9 = vld [vmem:[%s473_s1 + $0x10] sm:$0xff]  ;;  %v183_v10 = vld [vmem:[%s473_s1 + $0x8] sm:$0xff] }
   0xc   : > { %172 = vst.msk [vmem:[#allocation2] sm:$0xff] %vm171_vm0, %v389_v0  ;;  %s358_s14 = sshll.u32 %s477_s13, 5  ;;  %361 = vmatpush.msra.mxu2 %v184_v9  ;;  %268 = vmatpush.msra.mxu0 %v184_v9  ;;  %v182_v11 = vld [vmem:[%s473_s1] sm:$0xff]  ;;  %vm234_vm2 = vcmask 130048   ;;  %vm242_vm3 = vcmask 195584  }
   0xd   : > { %173 = vst.msk [vmem:[#allocation2 + $0x8] sm:$0xff] %vm171_vm0, %v389_v0  ;;  %s165_s17 = scalar_lea.vmem %s472_s0, %s358_s14  ;;  %362 = vmatpush.msra.mxu3 %v184_v9  ;;  %360 = vmatpush.msra.mxu1 %v184_v9  ;;  %v380_v32 = vld [vmem:[%s474_s2] ss:$0 sm:$0xff]  ;;  %s170_s30 = scalar_lea.vmem %s475_s3, %s358_s14 }
   0xe   : > { %174 = vst.msk [vmem:[#allocation2 + $0x10] sm:$0xff] %vm171_vm0, %v389_v0  ;;  %v180_v1 = vld [vmem:[%s165_s17 + $0x10] sm:$0xff]  ;;  %v178_v2 = vld [vmem:[%s165_s17] sm:$0xff]  ;;  %v179_v3 = vld [vmem:[%s165_s17 + $0x8] sm:$0xff]  ;;  %364 = vmatpush.msra.mxu2 %v183_v10  ;;  %269 = vmatpush.msra.mxu0 %v183_v10 }
   0xf   : > { %175 = vst.msk [vmem:[#allocation2 + $0x18] sm:$0xff] %vm171_vm0, %v389_v0  ;;  %206 = vrot.lane.b32.xlu0 %v180_v1, %s390_s18  ;;  %v181_v4 = vld [vmem:[%s165_s17 + $0x18] sm:$0xff]  ;;  %202 = vrot.lane.b32.xlu2 %v178_v2, %s390_s18 }
  0x10   : > { %177 = vst.msk [vmem:[#allocation2 + $0x20] sm:$0x3] %vm176_vm1, %v389_v0  ;;  %365 = vmatpush.msra.mxu3 %v183_v10  ;;  %363 = vmatpush.msra.mxu1 %v183_v10 }
  0x11   : > { %186 = vst.msk [vmem:[#allocation2 + $0x1] sm:$0xff] %vm171_vm0, %v178_v2  ;;  %367 = vmatpush.msra.mxu2 %v182_v11  ;;  %270 = vmatpush.msra.mxu0 %v182_v11 }
  0x12   : > { %187 = vst.msk [vmem:[#allocation2 + $0x9] sm:$0xff] %vm171_vm0, %v179_v3  ;;  %368 = vmatpush.msra.mxu3 %v182_v11  ;;  %366 = vmatpush.msra.mxu1 %v182_v11 }
  0x13   : > { %188 = vst.msk [vmem:[#allocation2 + $0x11] sm:$0xff] %vm171_vm0, %v180_v1 }
  0x14   : > { %189 = vst.msk [vmem:[#allocation2 + $0x19] sm:$0xff] %vm171_vm0, %v181_v4 }
  0x17   : > { %208 = vrot.lane.b32.xlu0 %v181_v4, %s390_s18  ;;  %204 = vrot.lane.b32.xlu2 %v179_v3, %s390_s18 }
  0x18   : > { %v190_v18 = vld [vmem:[#allocation2] sm:$0xff] }
  0x19   : > { %v194_v6 = vld [vmem:[#allocation2 + $0x2] sm:$0xff] }
  0x1a   : > { %v195_v8 = vld [vmem:[#allocation2 + $0xa] sm:$0xff] }
  0x1b   : > { %v196_v5 = vld [vmem:[#allocation2 + $0x12] sm:$0xff]  ;;  %v197_v7 = vld [vmem:[#allocation2 + $0x1a] sm:$0xff]  ;;  %v191_v28 = vld [vmem:[#allocation2 + $0x8] sm:$0xff] }
  0x1c   : > { %222 = vrot.lane.b32.xlu1 %v196_v5, %s391_s19  ;;  %v192_v13 = vld [vmem:[#allocation2 + $0x10] sm:$0xff]  ;;  %v193_v20 = vld [vmem:[#allocation2 + $0x18] sm:$0xff] }
  0x1f   : > { %218 = vrot.lane.b32.xlu0 %v194_v6, %s391_s19 }
  0x24   : > { %224 = vrot.lane.b32.xlu1 %v197_v7, %s391_s19 }
  0x2c   : > { %220 = vrot.lane.b32.xlu1 %v195_v8, %s391_s19 }
  0x69   : > { %v203_v17 = vpop.permute.xlu2 %202 }
  0x6a   : > { %v230_v21 = vsel %vm171_vm0, %v190_v18, %v203_v17 }
  0x71   : > { %v205_v27 = vpop.permute.xlu2 %204 }
  0x72   : > { %v231_v29 = vsel %vm171_vm0, %v191_v28, %v205_v27 }
  0x81   : > { %v207_v12 = vpop.permute.xlu0 %206 }
  0x82   : > { %v232_v15 = vsel %vm171_vm0, %v192_v13, %v207_v12 }
  0x89   : > { %v209_v14 = vpop.permute.xlu0 %208 }
  0x8a   : > { %v233_v23 = vsel %vm171_vm0, %v193_v20, %v209_v14 }
  0x8e   : > { %v223_v16 = vpop.permute.xlu1 %222 }
  0x8f   : > { %v237_v19 = vsel %vm234_vm2, %v232_v15, %v223_v16 }
  0x90   : > { %354 = vmatmul.msk.f32.vlgmr.msra.gmra.mxu2 %vm242_vm3, %v237_v19 }
  0x91   : > { %v219_v22 = vpop.permute.xlu0 %218 }
  0x92   : > { %v235_v24 = vsel %vm234_vm2, %v230_v21, %v219_v22 }
  0x93   : > { %352 = vmatmul.msk.f32.vlgmr.msra.gmra.mxu0 %vm242_vm3, %v235_v24 }
  0x96   : > { %v225_v25 = vpop.permute.xlu1 %224 }
  0x97   : > { %v238_v26 = vsel %vm234_vm2, %v233_v23, %v225_v25 }
  0x98   : > { %355 = vmatmul.msk.f32.vlgmr.msra.gmra.mxu3 %vm242_vm3, %v238_v26 }
  0x9e   : > { %v221_v30 = vpop.permute.xlu1 %220 }
  0x9f   : > { %v236_v31 = vsel %vm234_vm2, %v231_v29, %v221_v30 }
  0xa0   : > { %353 = vmatmul.msk.f32.vlgmr.msra.gmra.mxu1 %vm242_vm3, %v236_v31 }
 0x110   : > { %v272_v33 = vpop.f32.mrf.mxu0 }
 0x111   : > { %v273_v35 = vadd.f32 %v380_v32, %v272_v33 }
 0x113   : > { %v278_v34 = vpop.f32.mrf.mxu2  ;;  %284 = vst.msk [vmem:[%s170_s30] sm:$0xff] %vm171_vm0, %v273_v35 }
 0x114   : > { %v279_v36 = vadd.f32 %v380_v32, %v278_v34 }
 0x116   : > { %286 = vst.msk [vmem:[%s170_s30 + $0x10] sm:$0xff] %vm171_vm0, %v279_v36 }
 0x11b   : > { %v281_v37 = vpop.f32.mrf.mxu3 }
 0x11c   : > { %v282_v38 = vadd.f32 %v380_v32, %v281_v37 }
 0x11d   : > { %v275_v39 = vpop.f32.mrf.mxu1 }
 0x11e   : > { %287 = vst.msk [vmem:[%s170_s30 + $0x18] sm:$0xff] %vm171_vm0, %v282_v38  ;;  %v276_v40 = vadd.f32 %v380_v32, %v275_v39 }
 0x120   : > { %285 = vst.msk [vmem:[%s170_s30 + $0x8] sm:$0xff] %vm171_vm0, %v276_v40 }
 0x121 PF: > { %s13_s12 = sadd.s32 1, %s387_s12  }
 0x122   : > { %p10_p4 = scmp.ge.s32.totalorder %s13_s12, 4  }
 0x124   :  { %12 = sbr.rel (!%p10_p4) target bundleno = 1 (0x1), region = 62 }

// kernel: vq_decoder_forward.3
= control target key start
LH: loop header
LB: loop body
LE: loop exit
PB: predicated region body
PF: predicated region fallthrough
CT: control target
= control target key end

     0   :  { %s1718_s0 = inlined_call_operand.hbm [shape: f32[2,8,12], index: 0, kind: input, shape index: {}]   ;;  %s1719_s1 = inlined_call_operand.hbm [shape: f32[36,32], index: 1, kind: input, shape index: {}]   ;;  %s1720_s2 = inlined_call_operand.vmem [shape: f32[1,32], index: 2, kind: input, shape index: {}, may-alias: {2,4,6,8,10,12}]   ;;  %s1721_s3 = inlined_call_operand.hbm [shape: f32[96,32], index: 3, kind: input, shape index: {}]   ;;  %s1722_s4 = inlined_call_operand.vmem [shape: f32[1,32], index: 4, kind: input, shape index: {}, may-alias: {2,4,6,8,10,12}]   ;;  %s1723_s5 = inlined_call_operand.hbm [shape: f32[96,32], index: 5, kind: input, shape index: {}]   ;;  %s1724_s6 = inlined_call_operand.vmem [shape: f32[1,32], index: 6, kind: input, shape index: {}, may-alias: {2,4,6,8,10,12}]   ;;  %s1725_s7 = inlined_call_operand.hbm [shape: f32[96,32], index: 7, kind: input, shape index: {}]   ;;  %s1726_s8 = inlined_call_operand.vmem [shape: f32[1,32], index: 8, kind: input, shape index: {}, may-alias: {2,4,6,8,10,12}]   ;;  %s1727_s9 = inlined_call_operand.hbm [shape: f32[96,32], index: 9, kind: input, shape index: {}]   ;;  %s1728_s10 = inlined_call_operand.vmem [shape: f32[1,32], index: 10, kind: input, shape index: {}, may-alias: {2,4,6,8,10,12}]   ;;  %s1729_s11 = inlined_call_operand.hbm [shape: f32[96,32], index: 11, kind: input, shape index: {}]   ;;  %s1730_s12 = inlined_call_operand.vmem [shape: f32[1,32], index: 12, kind: input, shape index: {}, may-alias: {2,4,6,8,10,12}]   ;;  %s1731_s13 = inlined_call_operand.vmem [shape: f32[2,8,32], index: 13, kind: output, shape index: {}]  }
   0x1   :  { %1732 = sst [smem:[#allocation18_spill]] %s1719_s1 }
   0x2   :  { %1733 = sst [smem:[#allocation19_spill]] %s1723_s5 }
   0x3   :  { %1734 = sst [smem:[#allocation20_spill]] %s1731_s13 }
   0x4   :  { %18 = vsyncpa [#allocation4], 0 }
   0x5   :  { %20 = vsyncpa [#allocation4 + $0x1], 0 }
   0x6   :  { %21 = vsyncpa [#allocation6], 0 }
   0x7   :  { %22 = vsyncpa [#allocation9], 0 }
   0x8   :  { %23 = vsyncpa [#allocation12], 0  ;;  %s1493_s25 = smov 0   ;;  %s1495_s26 = smov 0  }
   0x9   :  { %s1497_s27 = smov 0   ;;  %s1499_s28 = smov 0  }
   0xa LB: > { %s1735_s1 = sld [smem:[#allocation18_spill]]  ;;  %s1517_s15 = sadd.s32 4294967295, %s1408_s28   ;;  %s1408_s28 = sphi %s1499_s28, %s1745_s28   ;;  %s1404_s27 = sphi %s1497_s27, %s1744_s27   ;;  %s1400_s26 = sphi %s1495_s26, %s1743_s26   ;;  %s1396_s25 = sphi %s1493_s25, %s1742_s25  }
   0xb   : > { %p1011_p0 = scmp.ge.s32.totalorder %s1408_s28, 1  ;;  %p50_p1 = scmp.eq.s32.totalorder %s1517_s15, 0 }
   0xc   : > { %p338_p2 = scmp.lt.s32.totalorder %s1408_s28, 3  ;;  %s1410_s17 = smov [#allocation5]  }
   0xd   : > { %s351_s18 = sshll.u32 %s1410_s17, 4  ;;  %s1737_s5 = sld [smem:[#allocation19_spill]]  ;;  %s352_s18 = int_to_ptr.vmem [resolvable:$true] %s351_s18 }
   0xe   : > { %p1522_p3 = pnand %p1011_p0, %p338_p2  ;;  %s417_s29 = sshll.u32 %s1727_s9, 4  ;;  %s418_s29 = int_to_ptr.hbm [resolvable:$true] %s417_s29 }
   0xf   : > { %s1411_s30 = smov [#allocation8]   ;;  %s1413_s13 = smov 8  }
  0x10   : > { %s349_s14 = sshll.u32 %s1735_s1, 4  ;;  %p1065_p4 = pneg %p1522_p3  ;;  %s350_s14 = int_to_ptr.hbm [resolvable:$true] %s349_s14 }
  0x11   : > { %s385_s17 = sshll.u32 %s1411_s30, 4  ;;  %s1412_s1 = smov 128   ;;  %s386_s17 = int_to_ptr.vmem [resolvable:$true] %s385_s17 }
  0x12   : > { %p1533_p5 = pnand %p1065_p4, %p50_p1  ;;  %s366_s23 = sshll.u32 %s1721_s3, 4  ;;  %s367_s23 = int_to_ptr.hbm [resolvable:$true] %s366_s23 }
  0x13   : > { %s383_s21 = sshll.u32 %s1737_s5, 4  ;;  %s1414_s24 = smov [#allocation11]   ;;  %s384_s21 = int_to_ptr.hbm [resolvable:$true] %s383_s21 }
  0x14   : > { %1068 = dma.hbm_to_vmem [thread:$0]  (!%p1533_p5), %s350_s14, 640, %s352_s18, [#allocation6], %s1412_s1, %s1412_s1, %s1413_s13  }
  0x15   : > { %1074 = dma.hbm_to_vmem [thread:$0]  (!%p1533_p5), %s384_s21, 1536, %s386_s17, [#allocation9], %s1412_s1, %s1412_s1, %s1413_s13  }
  0x16   : > { %s419_s30 = sshll.u32 %s1414_s24, 4  ;;  %s1415_s14 = smov [#allocation7]   ;;  %s420_s30 = int_to_ptr.vmem [resolvable:$true] %s419_s30 }
  0x17   : > { %1080 = dma.hbm_to_vmem [thread:$0]  (!%p1533_p5), %s418_s29, 1536, %s420_s30, [#allocation12], %s1412_s1, %s1412_s1, %s1413_s13  }
  0x18   : > { %s368_s18 = sshll.u32 %s1415_s14, 4  ;;  %s400_s17 = sshll.u32 %s1725_s7, 4  ;;  %s369_s18 = int_to_ptr.vmem [resolvable:$true] %s368_s18  ;;  %s401_s17 = int_to_ptr.hbm [resolvable:$true] %s400_s17 }
  0x19   : > { %1071 = dma.hbm_to_vmem [thread:$0]  (!%p1533_p5), %s367_s23, 1536, %s369_s18, [#allocation6], %s1412_s1, %s1412_s1, %s1413_s13  }
  0x1a   : > { %s434_s20 = sshll.u32 %s1729_s11, 4  ;;  %s1416_s5 = smov [#allocation10]   ;;  %s435_s20 = int_to_ptr.hbm [resolvable:$true] %s434_s20 }
  0x1b   : > { %s402_s24 = sshll.u32 %s1416_s5, 4  ;;  %s1417_s23 = smov [#allocation13]   ;;  %s403_s24 = int_to_ptr.vmem [resolvable:$true] %s402_s24 }
  0x1c   : > { %1077 = dma.hbm_to_vmem [thread:$0]  (!%p1533_p5), %s401_s17, 1536, %s403_s24, [#allocation9], %s1412_s1, %s1412_s1, %s1413_s13  }
  0x1d   : > { %s436_s30 = sshll.u32 %s1417_s23, 4  ;;  %s1580_s14 = sadd.s32 1, %s1408_s28   ;;  %s437_s30 = int_to_ptr.vmem [resolvable:$true] %s436_s30 }
  0x1e   : > { %1083 = dma.hbm_to_vmem [thread:$0]  (!%p1533_p5), %s435_s20, 1536, %s437_s30, [#allocation12], %s1412_s1, %s1412_s1, %s1413_s13  }
  0x1f   : > { %s33_s18 = ssub.s32 %s1408_s28, %s1580_s14  ;;  %s36_s21 = sadd.s32 1, %s1404_s27 }
  0x20   : > { %p34_p6 = scmp.eq.s32.totalorder %s33_s18, 0  ;;  %p43_p7 = scmp.ne.s32.totalorder %s1404_s27, %s1400_s26 }
  0x21   : > { %p44_p8 = scmp.eq.s32.totalorder %s1408_s28, 0  ;;  %p49_p9 = scmp.ne.s32.totalorder %s1400_s26, %s1396_s25 }
  0x22   : > { %s1591_s29 = scalar_select %p34_p6, %s1404_s27, %s36_s21  }
  0x23   : > { %p1595_p10 = por %p50_p1, %p49_p9  ;;  %p1094_p11 = scmp.lt.s32.totalorder %s1408_s28, 2 }
  0x24   : > { %s453_s22 = sand.u32 1, %s1404_s27   ;;  %s1020_s19 = sshll.u32 %s1408_s28, 3 }
  0x25   : > { %p45_p12 = por %p44_p8, %p43_p7  ;;  %s1019_s1 = sshll.u32 %s453_s22, 3 }
  0x26   : > { %s461_s5 = scalar_lea.hbm %s1718_s0, %s1020_s19  ;;  %s457_s23 = scalar_lea.vmem [#allocation3], %s1019_s1 }
  0x27   : > { %s463_s24 = sshll.u32 %s461_s5, 4  ;;  %s465_s30 = sshll.u32 %s457_s23, 4  ;;  %s464_s24 = int_to_ptr.hbm [resolvable:$true] %s463_s24  ;;  %s466_s30 = int_to_ptr.vmem [resolvable:$true] %s465_s30 }
  0x28   : > { %p1605_p13 = pnand %p1094_p11, %p45_p12  ;;  %s454_s18 = scalar_lea.sflag [#allocation4], %s453_s22 }
  0x29   : > { %s1332_s21 = sshra.s32 %s464_s24, 4  ;;  %s1339_s1 = scalar_lea.hbm %s1718_s0, 16  ;;  %s1333_s21 = int_to_ptr.hbm [resolvable:$true] %s1332_s21 }
  0x2a   : > { %s1334_s28 = scalar_lea.hbm %s1333_s21, 8  ;;  %p1336_p2 = pneg %p1605_p13 }
  0x2b   : > { %p1335_p0 = scmp.ne.s32.totalorder %s1333_s21, %s1334_s28  ;;  %p1340_p6 = scmp.lt.s32.totalorder %s1333_s21, %s1718_s0 }
  0x2c   : > { %p1341_p7 = scmp.lt.s32.totalorder %s1339_s1, %s1334_s28 }
  0x2d   : > { %p1337_p4 = pnand %p1336_p2, %p1335_p0 }
  0x2e   : > { %p1342_p8 = por %p1341_p7, %p1340_p6 }
  0x2f   : > { %p1338_p5 = pneg %p1337_p4 }
  0x31   : > { %p1343_p9 = pnand %p1342_p8, %p1338_p5 }
  0x33   : > { %1346 = shalt.err (!%p1343_p9)
}
  0x34   : > { %1087 = dma.hbm_to_vmem [thread:$0]  (!%p1605_p13), %s464_s24, 128, %s466_s30, %s454_s18  }
  0x35   : > { %474 = sbr.rel (%p1522_p3) target bundleno = 1575 (0x627), region = 72  ;;  %s476_s22 = sand.u32 (!%p1522_p3), 1, %s1400_s26  }
  0x36   : > { %s1022_s23 = sshll.u32 (!%p1522_p3), %s476_s22, 3  ;;  %s477_s19 = scalar_lea.sflag (!%p1522_p3), [#allocation4], %s476_s22 }
  0x37   : > { %s480_s13 = scalar_lea.vmem (!%p1522_p3), [#allocation3], %s1022_s23 }
  0x3a   : > { %1379 = dma.done.wait (%p1595_p10), %s477_s19, 128  }
  0x3b   : > { %1381 = vsyncadd (%p1595_p10), %s477_s19, 4294967168 }
  0x3c   : > { %1383 = dma.done.wait (%p50_p1), [#allocation6], 2176  }
  0x3d   : > { %1385 = vsyncadd (%p50_p1), [#allocation6], 4294965120 }
  0x3e   : > { %1387 = dma.done.wait (%p50_p1), [#allocation9], 3072  }
  0x3f   : > { %1389 = vsyncadd (%p50_p1), [#allocation9], 4294964224 }
  0x40   : > { %1391 = dma.done.wait (%p50_p1), [#allocation12], 3072  }
  0x41   : > { %1393 = vsyncadd (%p50_p1), [#allocation12], 4294964224  ;;  %vm557_vm0 = vcmask 261120   ;;  %vm559_vm1 = vcmask 254976   ;;  %v1418_v0 = vmov 0.0   ;;  %vm568_vm2 = vcmask 97280  }
  0x42   : > { %558 = vst.msk [vmem:[#allocation2] sm:$0xff] %vm557_vm0, %v1418_v0  ;;  %v561_v1 = vld [vmem:[%s480_s13] sm:$0xff]  ;;  %s1419_s16 = smov 12   ;;  %s1420_s17 = smov 24   ;;  %v566_v3 = vld [vmem:[#allocation5 + $0x20] sm:$0xf] }
  0x43   : > { %560 = vst.msk [vmem:[#allocation2 + $0x8] sm:$0x3] %vm559_vm1, %v1418_v0  ;;  %573 = vrot.lane.b32.xlu0 %v561_v1, %s1419_s16  ;;  %vm590_vm3 = vcmask 1043456   ;;  %v565_v4 = vld [vmem:[#allocation5 + $0x18] sm:$0xff]  ;;  %v564_v5 = vld [vmem:[#allocation5 + $0x10] sm:$0xff]  ;;  %v563_v6 = vld [vmem:[#allocation5 + $0x8] sm:$0xff] }
  0x44   : > { %569 = vst.msk [vmem:[#allocation2 + $0x1] sm:$0xff] %vm568_vm2, %v561_v1  ;;  %1030 = vmatpush.msk.msra.mxu0 %vm590_vm3, %v566_v3  ;;  %v562_v7 = vld [vmem:[#allocation5] sm:$0xff]  ;;  %vm581_vm4 = vcmask 195584   ;;  %vm586_vm5 = vcmask 293888   ;;  %v624_v14 = vld [vmem:[#allocation7 + $0x50] sm:$0xff]  ;;  %v623_v15 = vld [vmem:[#allocation7 + $0x48] sm:$0xff] }
  0x45   : > { %v625_v13 = vld [vmem:[#allocation7 + $0x58] sm:$0xff]  ;;  %v622_v16 = vld [vmem:[#allocation7 + $0x40] sm:$0xff]  ;;  %v620_v18 = vld [vmem:[#allocation7 + $0x30] sm:$0xff]  ;;  %s1421_s25 = smov 32   ;;  %s1422_s18 = smov 64   ;;  %vm652_vm6 = vcmask 523264  }
  0x46   : > { %606 = vmatpush.msra.mxu0 %v565_v4  ;;  %665 = vmatpush.msra.mxu1 %v625_v13  ;;  %v621_v17 = vld [vmem:[#allocation7 + $0x38] sm:$0xff]  ;;  %v619_v19 = vld [vmem:[#allocation7 + $0x28] sm:$0xff]  ;;  %v618_v24 = vld [vmem:[#allocation7 + $0x20] sm:$0xff]  ;;  %vm657_vm7 = vcmask 785408   ;;  %p553_p1 = scmp.lt.s32.totalorder %s1517_s15, 1 }
  0x47   : > { %v1146_v20 = vld [vmem:[%s1720_s2] ss:$0 sm:$0xff]  ;;  %v616_v26 = vld [vmem:[#allocation7 + $0x10] sm:$0xff]  ;;  %v615_v27 = vld [vmem:[#allocation7 + $0x8] sm:$0xff] }
  0x48   : > { %607 = vmatpush.msra.mxu0 %v564_v5  ;;  %666 = vmatpush.msra.mxu1 %v624_v14  ;;  %v617_v25 = vld [vmem:[#allocation7 + $0x18] sm:$0xff]  ;;  %v614_v28 = vld [vmem:[#allocation7] sm:$0xff]  ;;  %v637_v35 = vld [vmem:[#allocation8 + $0x50] sm:$0xff]  ;;  %s1747_s15 = smov (!%p553_p1, %s1517_s15), 1 }
  0x49   : > { %v638_v34 = vld [vmem:[#allocation8 + $0x58] sm:$0xff]  ;;  %v636_v36 = vld [vmem:[#allocation8 + $0x48] sm:$0xff]  ;;  %v635_v37 = vld [vmem:[#allocation8 + $0x40] sm:$0xff] }
  0x4a   : > { %608 = vmatpush.msra.mxu0 %v563_v6  ;;  %667 = vmatpush.msra.mxu1 %v623_v15  ;;  %v634_v38 = vld [vmem:[#allocation8 + $0x38] sm:$0xff]  ;;  %v633_v39 = vld [vmem:[#allocation8 + $0x30] sm:$0xff]  ;;  %v632_v40 = vld [vmem:[#allocation8 + $0x28] sm:$0xff] }
  0x4b   : > { %v571_v2 = vld [vmem:[#allocation2 + $0x2] sm:$0xff]  ;;  %707 = vmatpush.msra.mxu2 %v638_v34  ;;  %v1147_v41 = vld [vmem:[%s1722_s4] ss:$0 sm:$0xff]  ;;  %v629_v49 = vld [vmem:[#allocation8 + $0x10] sm:$0xff] }
  0x4c   : > { %577 = vrot.lane.b32.xlu0 %v571_v2, %s1420_s17  ;;  %609 = vmatpush.msra.mxu0 %v562_v7  ;;  %v570_v9 = vld [vmem:[#allocation2] sm:$0xff]  ;;  %v631_v47 = vld [vmem:[#allocation8 + $0x20] sm:$0xff]  ;;  %v628_v50 = vld [vmem:[#allocation8 + $0x8] sm:$0xff]  ;;  %s1029_s17 = sshll.u32 %s1747_s15, 3 }
  0x4d   : > { %668 = vmatpush.msra.mxu1 %v622_v16  ;;  %708 = vmatpush.msra.mxu2 %v637_v35  ;;  %v630_v48 = vld [vmem:[#allocation8 + $0x18] sm:$0xff]  ;;  %v627_v51 = vld [vmem:[#allocation8] sm:$0xff]  ;;  %v734_v58 = vld [vmem:[#allocation10 + $0x50] sm:$0xff] }
  0x4e   : > { %v735_v57 = vld [vmem:[#allocation10 + $0x58] sm:$0xff]  ;;  %v733_v59 = vld [vmem:[#allocation10 + $0x48] sm:$0xff]  ;;  %v732_v60 = vld [vmem:[#allocation10 + $0x40] sm:$0xff] }
  0x4f   : > { %669 = vmatpush.msra.mxu1 %v621_v17  ;;  %709 = vmatpush.msra.mxu2 %v636_v36  ;;  %v731_v61 = vld [vmem:[#allocation10 + $0x38] sm:$0xff]  ;;  %v730_v62 = vld [vmem:[#allocation10 + $0x30] sm:$0xff]  ;;  %v729_v63 = vld [vmem:[#allocation10 + $0x28] sm:$0xff] }
  0x50   : > { %773 = vmatpush.msra.mxu3 %v735_v57  ;;  %v1148_v0 = vld [vmem:[%s1724_s6] ss:$0 sm:$0xff]  ;;  %v728_v5 = vld [vmem:[#allocation10 + $0x20] sm:$0xff]  ;;  %v726_v7 = vld [vmem:[#allocation10 + $0x10] sm:$0xff] }
  0x51   : > { %670 = vmatpush.msra.mxu1 %v620_v18  ;;  %710 = vmatpush.msra.mxu2 %v635_v37  ;;  %v727_v6 = vld [vmem:[#allocation10 + $0x18] sm:$0xff] }
  0x52   : > { %774 = vmatpush.msra.mxu3 %v734_v58  ;;  %v1149_v15 = vld [vmem:[%s1726_s8] ss:$0 sm:$0xff] }
  0x53   : > { %671 = vmatpush.msra.mxu1 %v619_v19  ;;  %711 = vmatpush.msra.mxu2 %v634_v38  ;;  %v843_v38 = vld [vmem:[#allocation13 + $0x58] sm:$0xff] }
  0x54   : > { %775 = vmatpush.msra.mxu3 %v733_v59 }
  0x55   : > { %672 = vmatpush.msra.mxu1 %v618_v24  ;;  %712 = vmatpush.msra.mxu2 %v633_v39  ;;  %v745_v24 = vld [vmem:[#allocation11 + $0x40] sm:$0xff]  ;;  %v842_v39 = vld [vmem:[#allocation13 + $0x50] sm:$0xff] }
  0x56   : > { %776 = vmatpush.msra.mxu3 %v732_v60  ;;  %v1151_v60 = vld [vmem:[%s1730_s12] ss:$0 sm:$0xff] }
  0x57   : > { %673 = vmatpush.msra.mxu1 %v617_v25  ;;  %713 = vmatpush.msra.mxu2 %v632_v40  ;;  %v744_v25 = vld [vmem:[#allocation11 + $0x38] sm:$0xff]  ;;  %v841_v40 = vld [vmem:[#allocation13 + $0x48] sm:$0xff] }
  0x58   : > { %777 = vmatpush.msra.mxu3 %v731_v61 }
  0x59   : > { %674 = vmatpush.msra.mxu1 %v616_v26  ;;  %714 = vmatpush.msra.mxu2 %v631_v47  ;;  %v743_v26 = vld [vmem:[#allocation11 + $0x30] sm:$0xff]  ;;  %v839_v47 = vld [vmem:[#allocation13 + $0x38] sm:$0xff] }
  0x5a   : > { %778 = vmatpush.msra.mxu3 %v730_v62 }
  0x5b   : > { %675 = vmatpush.msra.mxu1 %v615_v27  ;;  %715 = vmatpush.msra.mxu2 %v630_v48  ;;  %v742_v27 = vld [vmem:[#allocation11 + $0x28] sm:$0xff]  ;;  %v838_v48 = vld [vmem:[#allocation13 + $0x30] sm:$0xff] }
  0x5c   : > { %779 = vmatpush.msra.mxu3 %v729_v63 }
  0x5d   : > { %676 = vmatpush.msra.mxu1 %v614_v28  ;;  %716 = vmatpush.msra.mxu2 %v629_v49  ;;  %v741_v28 = vld [vmem:[#allocation11 + $0x20] sm:$0xff]  ;;  %v837_v49 = vld [vmem:[#allocation13 + $0x28] sm:$0xff] }
  0x5e   : > { %780 = vmatpush.msra.mxu3 %v728_v5 }
  0x5f   : > { %717 = vmatpush.msra.mxu2 %v628_v50  ;;  %868 = vmatpush.msrb.mxu1 %v843_v38  ;;  %v836_v50 = vld [vmem:[#allocation13 + $0x20] sm:$0xff] }
  0x60   : > { %781 = vmatpush.msra.mxu3 %v727_v6 }
  0x61   : > { %718 = vmatpush.msra.mxu2 %v627_v51  ;;  %869 = vmatpush.msrb.mxu1 %v842_v39  ;;  %v835_v51 = vld [vmem:[#allocation13 + $0x18] sm:$0xff] }
  0x62   : > { %782 = vmatpush.msra.mxu3 %v726_v7 }
  0x63   : > { %870 = vmatpush.msrb.mxu1 %v841_v40 }
  0xb5   : > { %v574_v8 = vpop.permute.xlu0 %573 }
  0xb6   : > { %v580_v10 = vsel %vm568_vm2, %v570_v9, %v574_v8  ;;  %v725_v8 = vld [vmem:[#allocation10 + $0x8] sm:$0xff]  ;;  %v724_v9 = vld [vmem:[#allocation10] sm:$0xff] }
  0xb7   : > { %783 = vmatpush.msra.mxu3 %v725_v8 }
  0xb9   : > { %784 = vmatpush.msra.mxu3 %v724_v9 }
  0xbe   : > { %v578_v11 = vpop.permute.xlu0 %577 }
  0xbf   : > { %v582_v12 = vsel %vm581_vm4, %v580_v10, %v578_v11 }
  0xc0   : > { %1031 = vmatmul.msk.f32.vlgmr.msra.gmra.mxu0 %vm586_vm5, %v582_v12 }
 0x13d   : > { %v611_v21 = vpop.f32.mrf.mxu0 }
 0x13e   : > { %v1644_v22 = vadd.f32 %v1146_v20, %v611_v21  ;;  %v748_v21 = vld [vmem:[#allocation11 + $0x58] sm:$0xff] }
 0x13f   : > { %815 = vmatpush.msrb.mxu0 %v748_v21 }
 0x140   : > { %640 = vst.msk [vmem:[#allocation2 + $0x1] sm:$0xff] %vm557_vm0, %v1644_v22  ;;  %644 = vrot.lane.b32.xlu1 %v1644_v22, %s1421_s25 }
 0x147   : > { %v642_v23 = vld [vmem:[#allocation2 + $0x2] sm:$0xff] }
 0x148   : > { %648 = vrot.lane.b32.xlu1 %v642_v23, %s1422_s18  ;;  %v641_v30 = vld [vmem:[#allocation2] sm:$0xff]  ;;  %v746_v23 = vld [vmem:[#allocation11 + $0x48] sm:$0xff] }
 0x1b2   : > { %v645_v29 = vpop.permute.xlu1 %644 }
 0x1b3   : > { %v651_v31 = vsel %vm557_vm0, %v641_v30, %v645_v29  ;;  %v740_v29 = vld [vmem:[#allocation11 + $0x18] sm:$0xff]  ;;  %v739_v30 = vld [vmem:[#allocation11 + $0x10] sm:$0xff] }
 0x1ba   : > { %v649_v32 = vpop.permute.xlu1 %648 }
 0x1bb   : > { %v653_v33 = vsel %vm652_vm6, %v651_v31, %v649_v32  ;;  %v738_v31 = vld [vmem:[#allocation11 + $0x8] sm:$0xff]  ;;  %v737_v32 = vld [vmem:[#allocation11] sm:$0xff] }
 0x1bc   : > { %1032 = vmatmul.msk.f32.vlgmr.msra.gmra.mxu1 %vm657_vm7, %v653_v33 }
 0x239   : > { %v678_v42 = vpop.f32.mrf.mxu1 }
 0x23a   : > { %v679_v43 = vadd.f32 %v1147_v41, %v678_v42  ;;  %v1150_v41 = vld [vmem:[%s1728_s10] ss:$0 sm:$0xff] }
 0x23c   : > { %vm681_vm8 = vcmp.ge.f32.partialorder %v679_v43, 0.0  ;;  %v682_v44 = vmul.f32 0.2, %v679_v43 }
 0x23e   : > { %v683_v45 = vsel %vm681_vm8, %v679_v43, %v682_v44 }
 0x23f   : > { %688 = vrot.lane.b32.xlu2 %v683_v45, %s1421_s25  ;;  %684 = vst.msk [vmem:[#allocation2 + $0x1] sm:$0xff] %vm557_vm0, %v683_v45 }
 0x246   : > { %v686_v46 = vld [vmem:[#allocation2 + $0x2] sm:$0xff] }
 0x247   : > { %692 = vrot.lane.b32.xlu2 %v686_v46, %s1422_s18  ;;  %v685_v53 = vld [vmem:[#allocation2] sm:$0xff]  ;;  %v840_v46 = vld [vmem:[#allocation13 + $0x40] sm:$0xff] }
 0x248   : > { %871 = vmatpush.msrb.mxu1 %v840_v46 }
 0x24a   : > { %872 = vmatpush.msrb.mxu1 %v839_v47 }
 0x24c   : > { %873 = vmatpush.msrb.mxu1 %v838_v48 }
 0x24e   : > { %874 = vmatpush.msrb.mxu1 %v837_v49 }
 0x250   : > { %875 = vmatpush.msrb.mxu1 %v836_v50 }
 0x252   : > { %876 = vmatpush.msrb.mxu1 %v835_v51 }
 0x299   : > { %v689_v52 = vpop.permute.xlu2 %688 }
 0x29a   : > { %v695_v54 = vsel %vm557_vm0, %v685_v53, %v689_v52  ;;  %v834_v52 = vld [vmem:[#allocation13 + $0x10] sm:$0xff]  ;;  %v833_v53 = vld [vmem:[#allocation13 + $0x8] sm:$0xff] }
 0x29b   : > { %877 = vmatpush.msrb.mxu1 %v834_v52 }
 0x29d   : > { %878 = vmatpush.msrb.mxu1 %v833_v53 }
 0x2a1   : > { %v693_v55 = vpop.permute.xlu2 %692 }
 0x2a2   : > { %v696_v56 = vsel %vm652_vm6, %v695_v54, %v693_v55  ;;  %v832_v54 = vld [vmem:[#allocation13] sm:$0xff] }
 0x2a3   : > { %1033 = vmatmul.msk.f32.vlgmr.msra.gmra.mxu2 %vm657_vm7, %v696_v56  ;;  %879 = vmatpush.msrb.mxu1 %v832_v54 }
 0x326   : > { %v720_v1 = vpop.f32.mrf.mxu2 }
 0x327   : > { %v721_v2 = vadd.f32 %v1148_v0, %v720_v1 }
 0x329   : > { %v1667_v3 = vadd.f32 %v721_v2, %v1644_v22  ;;  %v747_v22 = vld [vmem:[#allocation11 + $0x50] sm:$0xff] }
 0x32a   : > { %816 = vmatpush.msrb.mxu0 %v747_v22 }
 0x32b   : > { %750 = vst.msk [vmem:[#allocation2 + $0x1] sm:$0xff] %vm557_vm0, %v1667_v3  ;;  %754 = vrot.lane.b32.xlu0 %v1667_v3, %s1421_s25 }
 0x32c   : > { %817 = vmatpush.msrb.mxu0 %v746_v23 }
 0x32e   : > { %818 = vmatpush.msrb.mxu0 %v745_v24 }
 0x330   : > { %819 = vmatpush.msrb.mxu0 %v744_v25 }
 0x332   : > { %v752_v4 = vld [vmem:[#allocation2 + $0x2] sm:$0xff]  ;;  %820 = vmatpush.msrb.mxu0 %v743_v26 }
 0x333   : > { %758 = vrot.lane.b32.xlu1 %v752_v4, %s1422_s18  ;;  %v751_v11 = vld [vmem:[#allocation2] sm:$0xff] }
 0x334   : > { %821 = vmatpush.msrb.mxu0 %v742_v27 }
 0x336   : > { %822 = vmatpush.msrb.mxu0 %v741_v28 }
 0x338   : > { %823 = vmatpush.msrb.mxu0 %v740_v29 }
 0x33a   : > { %824 = vmatpush.msrb.mxu0 %v739_v30 }
 0x33c   : > { %825 = vmatpush.msrb.mxu0 %v738_v31 }
 0x33e   : > { %826 = vmatpush.msrb.mxu0 %v737_v32 }
 0x39d   : > { %v755_v10 = vpop.permute.xlu0 %754 }
 0x39e   : > { %v761_v12 = vsel %vm557_vm0, %v751_v11, %v755_v10 }
 0x3a5   : > { %v759_v13 = vpop.permute.xlu1 %758 }
 0x3a6   : > { %v762_v14 = vsel %vm652_vm6, %v761_v12, %v759_v13 }
 0x3a7   : > { %1034 = vmatmul.msk.f32.vlgmr.msra.gmra.mxu3 %vm657_vm7, %v762_v14 }
 0x42a   : > { %v786_v16 = vpop.f32.mrf.mxu3 }
 0x42b   : > { %v787_v17 = vadd.f32 %v1149_v15, %v786_v16 }
 0x42d   : > { %v790_v18 = vmul.f32 0.2, %v787_v17  ;;  %vm789_vm9 = vcmp.ge.f32.partialorder %v787_v17, 0.0 }
 0x42f   : > { %v791_v19 = vsel %vm789_vm9, %v787_v17, %v790_v18 }
 0x430   : > { %796 = vrot.lane.b32.xlu2 %v791_v19, %s1421_s25  ;;  %792 = vst.msk [vmem:[#allocation2 + $0x1] sm:$0xff] %vm557_vm0, %v791_v19 }
 0x437   : > { %v794_v20 = vld [vmem:[#allocation2 + $0x2] sm:$0xff] }
 0x438   : > { %800 = vrot.lane.b32.xlu0 %v794_v20, %s1422_s18  ;;  %v793_v34 = vld [vmem:[#allocation2] sm:$0xff] }
 0x48a   : > { %v797_v33 = vpop.permute.xlu2 %796 }
 0x48b   : > { %v803_v35 = vsel %vm557_vm0, %v793_v34, %v797_v33 }
 0x4aa   : > { %v801_v36 = vpop.permute.xlu0 %800 }
 0x4ab   : > { %v804_v37 = vsel %vm652_vm6, %v803_v35, %v801_v36 }
 0x4ac   : > { %1035 = vmatmul.msk.f32.vlgmr.msrb.gmra.mxu0 %vm657_vm7, %v804_v37 }
 0x529   : > { %v828_v42 = vpop.f32.mrf.mxu0 }
 0x52a   : > { %v829_v43 = vadd.f32 %v1150_v41, %v828_v42 }
 0x52c   : > { %v831_v44 = vadd.f32 %v829_v43, %v1667_v3 }
 0x52e   : > { %845 = vst.msk [vmem:[#allocation2 + $0x1] sm:$0xff] %vm557_vm0, %v831_v44  ;;  %849 = vrot.lane.b32.xlu1 %v831_v44, %s1421_s25  ;;  %s1741_s25 = sld [smem:[#allocation20_spill]] }
 0x535   : > { %v847_v45 = vld [vmem:[#allocation2 + $0x2] sm:$0xff] }
 0x536   : > { %853 = vrot.lane.b32.xlu2 %v847_v45, %s1422_s18  ;;  %v846_v56 = vld [vmem:[#allocation2] sm:$0xff]  ;;  %s556_s18 = scalar_lea.vmem %s1741_s25, %s1029_s17 }
 0x590   : > { %v854_v57 = vpop.permute.xlu2 %853 }
 0x5a0   : > { %v850_v55 = vpop.permute.xlu1 %849 }
 0x5a1   : > { %v856_v58 = vsel %vm557_vm0, %v846_v56, %v850_v55 }
 0x5a2   : > { %v857_v59 = vsel %vm652_vm6, %v856_v58, %v854_v57 }
 0x5a3   : > { %1036 = vmatmul.msk.f32.vlgmr.msrb.gmra.mxu1 %vm657_vm7, %v857_v59 }
 0x620   : > { %v881_v61 = vpop.f32.mrf.mxu1 }
 0x621   : > { %v882_v62 = vadd.f32 %v1151_v60, %v881_v61 }
 0x623   : > { %vm884_vm10 = vcmp.ge.f32.partialorder %v882_v62, 0.0  ;;  %v885_v63 = vmul.f32 0.2, %v882_v62 }
 0x625   : > { %v886_v0 = vsel %vm884_vm10, %v882_v62, %v885_v63 }
 0x626   : > { %887 = vst.msk [vmem:[%s556_s18] sm:$0xff] %vm557_vm0, %v886_v0 }
 0x627 PF: > { %p26_p3 = scmp.ge.s32.totalorder %s1580_s14, 4   ;;  %s1742_s25 = smov %s1400_s26 }
 0x628   : > { %s1743_s26 = smov %s1404_s27  ;;  %s1744_s27 = smov %s1591_s29 }
 0x629   : > { %s1745_s28 = smov %s1580_s14  ;;  %28 = sbr.rel (!%p26_p3) target bundleno = 10 (0xa), region = 136 }
 0x62e   :  { %907 = vsyncpa [#allocation4], 1 }
 0x62f   :  { %909 = vsyncpa [#allocation4 + $0x1], 1 }
 0x630   :  { %910 = vsyncpa [#allocation6], 1 }
 0x631   :  { %911 = vsyncpa [#allocation9], 1 }
 0x632   :  { %912 = vsyncpa [#allocation12], 1 }

</bundles_post_ra>
